<compile_context>
chip_gen: v7x
topology: tpu7x:2x2x1
jax: 0.10.0
libtpu: 0.0.40
codegen_flags: <defaults>
</compile_context>

<pallas_src>
import math

import jax
import jax.numpy as jnp
from jax import lax
from jax.experimental import pallas as pl
from jax.experimental.pallas import tpu as pltpu

LN_EPS = 1e-5  # PyTorch nn.LayerNorm default


def _round_up(x, m):
    return ((x + m - 1) // m) * m


def _layernorm(h, gamma, beta):
    # Single-pass LayerNorm (PyTorch semantics: biased variance, eps in rsqrt).
    mu = jnp.mean(h, axis=-1, keepdims=True)
    ex2 = jnp.mean(h * h, axis=-1, keepdims=True)
    var = ex2 - mu * mu
    return (h - mu) * lax.rsqrt(var + LN_EPS) * gamma + beta


def critic_kernel(s_ref, a_ref, w1s_ref, w1a_ref, p1_ref, w2_ref, p2_ref, out_ref):
    s = s_ref[...]                      # (TB, input_dims)
    a = a_ref[...]                      # (TB, n_actions)

    # Packed per-layer vectors (kept 2-D for broadcasting).
    b1, g1, be1 = p1_ref[0:1, :], p1_ref[1:2, :], p1_ref[2:3, :]
    b2, g2, be2 = p2_ref[0:1, :], p2_ref[1:2, :], p2_ref[2:3, :]
    w3_row = p2_ref[3:4, :]             # (1, fc2)
    b3 = p2_ref[4:5, 0:1]               # (1, 1)

    # Linear1 (fused concat: split-weight matmuls) + ReLU + LayerNorm1
    h1 = (jnp.dot(s, w1s_ref[...], preferred_element_type=jnp.float32)
          + jnp.dot(a, w1a_ref[...], preferred_element_type=jnp.float32)
          + b1)
    h1 = jnp.maximum(h1, 0.0)
    h1 = _layernorm(h1, g1, be1)        # (TB, fc1)

    # Linear2 + ReLU + LayerNorm2
    h2 = jnp.dot(h1, w2_ref[...], preferred_element_type=jnp.float32) + b2
    h2 = jnp.maximum(h2, 0.0)
    h2 = _layernorm(h2, g2, be2)        # (TB, fc2)

    # Linear3 (N=1): VPU multiply + lane reduction instead of a lane-sparse MXU dot.
    q = jnp.sum(h2 * w3_row, axis=-1, keepdims=True) + b3   # (TB, 1)
    # Lane-dense store: cheap relayout of the (TB, 1) result vector into the
    # (1, TB) output row (TB is a multiple of 128 -> unmasked vst).
    out_ref[...] = q.reshape(out_ref.shape)


def critic_forward(state, action, params, *, max_rows_per_tile=2048):
    """Fused critic forward. state: (B, input_dims), action: (B, n_actions)."""
    state = state.astype(jnp.float32)
    action = action.astype(jnp.float32)

    B, input_dims = state.shape
    n_actions = action.shape[1]
    fc1 = params["w1s"].shape[1]
    fc2 = params["w2"].shape[1]

    # --- Batch tiling -------------------------------------------------------
    # Lane-dense output requires the tile to be a multiple of 128 lanes; pad B
    # so the tile divides it exactly (no partial/masked last tile).
    Bp = _round_up(B, 128)
    tb = min(max_rows_per_tile, Bp)
    # v7x megacore: prefer >= 2 grid steps when the batch permits, so the
    # "parallel" batch axis actually shards across both TensorCores.
    if Bp >= 256 and Bp // tb < 2:
        tb = _round_up(pl.cdiv(Bp, 2), 128)
    Bp = _round_up(Bp, tb)
    grid = (Bp // tb,)

    if Bp != B:
        pad = Bp - B
        state = jnp.pad(state, ((0, pad), (0, 0)))
        action = jnp.pad(action, ((0, pad), (0, 0)))

    def resident(shape):
        # Weights / packed params: same block every grid step -> stay in VMEM.
        return pl.BlockSpec(shape, lambda i: (0, 0))

    q_row = pl.pallas_call(
        critic_kernel,
        out_shape=jax.ShapeDtypeStruct((1, Bp), jnp.float32),
        grid=grid,
        in_specs=[
            pl.BlockSpec((tb, input_dims), lambda i: (i, 0)),   # state tile
            pl.BlockSpec((tb, n_actions), lambda i: (i, 0)),    # action tile
            resident((input_dims, fc1)),                        # w1 (state rows)
            resident((n_actions, fc1)),                         # w1 (action rows)
            resident((3, fc1)),                                 # [b1; g1; be1]
            resident((fc1, fc2)),                               # w2
            resident((5, fc2)),                                 # [b2; g2; be2; w3; b3]
        ],
        out_specs=pl.BlockSpec((1, tb), lambda i: (0, i)),      # lane-dense q row
        compiler_params=pltpu.CompilerParams(
            dimension_semantics=("parallel",),                  # megacore on v7x
            vmem_limit_bytes=32 * 1024 * 1024),                 # v5e default is 16 MiB
    )(state, action, params["w1s"], params["w1a"], params["p1"],
      params["w2"], params["p2"])

    # Back to the module's (B, 1) shape; drop padded rows.
    return q_row[0, :B].reshape(B, 1)


def init_params(key, input_dims, n_actions, fc1_dims, fc2_dims):
    """Init mimicking nn.Linear default U(-1/sqrt(fan_in), 1/sqrt(fan_in)).
    Weights stored pre-transposed (in, out); w1 pre-split into state/action rows;
    small per-layer vectors packed into stacked arrays for the kernel."""
    d_cat = input_dims + n_actions
    ks = jax.random.split(key, 6)

    def lin(kw, kb, fan_in, fan_out):
        bound = 1.0 / math.sqrt(fan_in)
        w = jax.random.uniform(kw, (fan_in, fan_out), jnp.float32, -bound, bound)
        b = jax.random.uniform(kb, (fan_out,), jnp.float32, -bound, bound)
        return w, b

    w1, b1 = lin(ks[0], ks[1], d_cat, fc1_dims)
    w2, b2 = lin(ks[2], ks[3], fc1_dims, fc2_dims)
    w3, b3 = lin(ks[4], ks[5], fc2_dims, 1)          # w3: (fc2, 1), b3: (1,)

    g1 = jnp.ones((fc1_dims,), jnp.float32)
    be1 = jnp.zeros((fc1_dims,), jnp.float32)
    g2 = jnp.ones((fc2_dims,), jnp.float32)
    be2 = jnp.zeros((fc2_dims,), jnp.float32)

    p1 = jnp.stack([b1, g1, be1], axis=0)                                  # (3, fc1)
    p2 = jnp.stack([b2, g2, be2, w3[:, 0],
                    jnp.full((fc2_dims,), b3[0], jnp.float32)], axis=0)    # (5, fc2)

    return {
        # kernel-packed params
        "w1s": w1[:input_dims], "w1a": w1[input_dims:],
        "p1": p1, "w2": w2, "p2": p2,
        # raw params (for the plain-JAX reference)
        "w1": w1, "b1": b1, "g1": g1, "be1": be1,
        "b2": b2, "g2": g2, "be2": be2,
        "w3": w3, "b3": b3,
    }


def reference_forward(state, action, p):
    """Plain-JAX reference matching the PyTorch forward semantics."""
    x = jnp.concatenate([state, action], axis=1)
    h = jnp.maximum(x @ p["w1"] + p["b1"], 0.0)
    mu = h.mean(-1, keepdims=True)
    var = ((h - mu) ** 2).mean(-1, keepdims=True)
    h = (h - mu) / jnp.sqrt(var + LN_EPS) * p["g1"] + p["be1"]
    h = jnp.maximum(h @ p["w2"] + p["b2"], 0.0)
    mu = h.mean(-1, keepdims=True)
    var = ((h - mu) ** 2).mean(-1, keepdims=True)
    h = (h - mu) / jnp.sqrt(var + LN_EPS) * p["g2"] + p["be2"]
    return h @ p["w3"] + p["b3"]


if __name__ == "__main__":
    # Small shapes consistent with the module's forward.
    B, input_dims, n_actions = 8, 16, 4
    fc1_dims, fc2_dims = 64, 32

    key = jax.random.PRNGKey(0)
    k_state, k_action, k_params, k_state2, k_action2 = jax.random.split(key, 5)

    params = init_params(k_params, input_dims, n_actions, fc1_dims, fc2_dims)

    # Case 1: tiny batch (single padded tile).
    state = jax.random.normal(k_state, (B, input_dims), jnp.float32)
    action = jax.random.normal(k_action, (B, n_actions), jnp.float32)
    q = jax.block_until_ready(critic_forward(state, action, params))
    q_ref = reference_forward(state, action, params)
    assert q.shape == (B, 1)
    assert jnp.allclose(q, q_ref, atol=1e-4, rtol=1e-4), (q, q_ref)

    # Case 2: batch that exercises padding + >= 2 grid steps (megacore path).
    B2 = 300
    state2 = jax.random.normal(k_state2, (B2, input_dims), jnp.float32)
    action2 = jax.random.normal(k_action2, (B2, n_actions), jnp.float32)
    q2 = jax.block_until_ready(critic_forward(state2, action2, params))
    q2_ref = reference_forward(state2, action2, params)
    assert q2.shape == (B2, 1)
    assert jnp.allclose(q2, q2_ref, atol=1e-4, rtol=1e-4), (q2, q2_ref)

    print("KERNEL_OK")
</pallas_src>

<mosaic_0001>
module attributes {stable_mosaic.version = 11 : i64} {
  func.func @critic_kernel(%arg0: i32, %arg1: memref<128x16xf32, #tpu.memory_space<vmem>>, %arg2: memref<128x4xf32, #tpu.memory_space<vmem>>, %arg3: memref<16x64xf32, #tpu.memory_space<vmem>>, %arg4: memref<4x64xf32, #tpu.memory_space<vmem>>, %arg5: memref<3x64xf32, #tpu.memory_space<vmem>>, %arg6: memref<64x32xf32, #tpu.memory_space<vmem>>, %arg7: memref<5x32xf32, #tpu.memory_space<vmem>>, %arg8: memref<1x128xf32, #tpu.memory_space<vmem>>) attributes {dimension_semantics = [#tpu.dimension_semantics<parallel>], iteration_bounds = array<i64: 1>, scalar_prefetch = 0 : i64, scratch_operands = 0 : i64, tpu.core_type = #tpu.core_type<tc>, window_params = [{transform_indices = @transform_0, window_bounds = array<i64: 128, 16>}, {transform_indices = @transform_1, window_bounds = array<i64: 128, 4>}, {pipeline_mode = #tpu.pipeline_mode<synchronous>, transform_indices = @transform_2, window_bounds = array<i64: 16, 64>}, {pipeline_mode = #tpu.pipeline_mode<synchronous>, transform_indices = @transform_3, window_bounds = array<i64: 4, 64>}, {pipeline_mode = #tpu.pipeline_mode<synchronous>, transform_indices = @transform_4, window_bounds = array<i64: 3, 64>}, {pipeline_mode = #tpu.pipeline_mode<synchronous>, transform_indices = @transform_5, window_bounds = array<i64: 64, 32>}, {pipeline_mode = #tpu.pipeline_mode<synchronous>, transform_indices = @transform_6, window_bounds = array<i64: 5, 32>}, {transform_indices = @transform_7, window_bounds = array<i64: 1, 128>}]} {
    %c0 = arith.constant 0 : index
    %c0_0 = arith.constant 0 : index
    %0 = vector.load %arg1[%c0, %c0_0] : memref<128x16xf32, #tpu.memory_space<vmem>>, vector<128x16xf32>
    %c0_1 = arith.constant 0 : index
    %c0_2 = arith.constant 0 : index
    %1 = vector.load %arg2[%c0_1, %c0_2] : memref<128x4xf32, #tpu.memory_space<vmem>>, vector<128x4xf32>
    %c0_3 = arith.constant 0 : index
    %c0_4 = arith.constant 0 : index
    %2 = vector.load %arg5[%c0_3, %c0_4] : memref<3x64xf32, #tpu.memory_space<vmem>>, vector<1x64xf32>
    %c1 = arith.constant 1 : index
    %c0_5 = arith.constant 0 : index
    %3 = vector.load %arg5[%c1, %c0_5] : memref<3x64xf32, #tpu.memory_space<vmem>>, vector<1x64xf32>
    %c2 = arith.constant 2 : index
    %c0_6 = arith.constant 0 : index
    %4 = vector.load %arg5[%c2, %c0_6] : memref<3x64xf32, #tpu.memory_space<vmem>>, vector<1x64xf32>
    %c0_7 = arith.constant 0 : index
    %c0_8 = arith.constant 0 : index
    %5 = vector.load %arg7[%c0_7, %c0_8] : memref<5x32xf32, #tpu.memory_space<vmem>>, vector<1x32xf32>
    %c1_9 = arith.constant 1 : index
    %c0_10 = arith.constant 0 : index
    %6 = vector.load %arg7[%c1_9, %c0_10] : memref<5x32xf32, #tpu.memory_space<vmem>>, vector<1x32xf32>
    %c2_11 = arith.constant 2 : index
    %c0_12 = arith.constant 0 : index
    %7 = vector.load %arg7[%c2_11, %c0_12] : memref<5x32xf32, #tpu.memory_space<vmem>>, vector<1x32xf32>
    %c3 = arith.constant 3 : index
    %c0_13 = arith.constant 0 : index
    %8 = vector.load %arg7[%c3, %c0_13] : memref<5x32xf32, #tpu.memory_space<vmem>>, vector<1x32xf32>
    %c4 = arith.constant 4 : index
    %c0_14 = arith.constant 0 : index
    %9 = vector.load %arg7[%c4, %c0_14] : memref<5x32xf32, #tpu.memory_space<vmem>>, vector<1x1xf32>
    %c0_15 = arith.constant 0 : index
    %c0_16 = arith.constant 0 : index
    %10 = vector.load %arg3[%c0_15, %c0_16] : memref<16x64xf32, #tpu.memory_space<vmem>>, vector<16x64xf32>
    %cst = arith.constant dense<0.000000e+00> : vector<128x64xf32>
    %11 = tpu.matmul %0, %10, %cst {dimension_numbers = #tpu.dot_dimension_numbers<[1], [0], [0], [1], [0, 0, 1, 1], [], []>} : vector<128x16xf32>, vector<16x64xf32>, vector<128x64xf32> -> vector<128x64xf32>
    %c0_17 = arith.constant 0 : index
    %c0_18 = arith.constant 0 : index
    %12 = vector.load %arg4[%c0_17, %c0_18] : memref<4x64xf32, #tpu.memory_space<vmem>>, vector<4x64xf32>
    %cst_19 = arith.constant dense<0.000000e+00> : vector<128x64xf32>
    %13 = tpu.matmul %1, %12, %cst_19 {dimension_numbers = #tpu.dot_dimension_numbers<[1], [0], [0], [1], [0, 0, 1, 1], [], []>} : vector<128x4xf32>, vector<4x64xf32>, vector<128x64xf32> -> vector<128x64xf32>
    %14 = arith.addf %11, %13 : vector<128x64xf32>
    %15 = vector.broadcast %2 : vector<1x64xf32> to vector<128x64xf32>
    %16 = arith.addf %14, %15 : vector<128x64xf32>
    %cst_20 = arith.constant 0.000000e+00 : f32
    %17 = vector.broadcast %cst_20 : f32 to vector<128x64xf32>
    %18 = arith.maximumf %16, %17 : vector<128x64xf32>
    %cst_21 = arith.constant dense<0.000000e+00> : vector<128xf32>
    %19 = vector.multi_reduction <add>, %18, %cst_21 [1] : vector<128x64xf32> to vector<128xf32>
    %20 = vector.shape_cast %19 : vector<128xf32> to vector<128x1xf32>
    %cst_22 = arith.constant 6.400000e+01 : f32
    %21 = vector.broadcast %cst_22 : f32 to vector<128x1xf32>
    %22 = arith.divf %20, %21 : vector<128x1xf32>
    %23 = arith.mulf %18, %18 : vector<128x64xf32>
    %cst_23 = arith.constant dense<0.000000e+00> : vector<128xf32>
    %24 = vector.multi_reduction <add>, %23, %cst_23 [1] : vector<128x64xf32> to vector<128xf32>
    %25 = vector.shape_cast %24 : vector<128xf32> to vector<128x1xf32>
    %cst_24 = arith.constant 6.400000e+01 : f32
    %26 = vector.broadcast %cst_24 : f32 to vector<128x1xf32>
    %27 = arith.divf %25, %26 : vector<128x1xf32>
    %28 = arith.mulf %22, %22 : vector<128x1xf32>
    %29 = arith.subf %27, %28 : vector<128x1xf32>
    %30 = vector.broadcast %22 : vector<128x1xf32> to vector<128x64xf32>
    %31 = arith.subf %18, %30 : vector<128x64xf32>
    %cst_25 = arith.constant 9.99999974E-6 : f32
    %32 = vector.broadcast %cst_25 : f32 to vector<128x1xf32>
    %33 = arith.addf %29, %32 : vector<128x1xf32>
    %34 = math.rsqrt %33 : vector<128x1xf32>
    %35 = vector.broadcast %34 : vector<128x1xf32> to vector<128x64xf32>
    %36 = arith.mulf %31, %35 : vector<128x64xf32>
    %37 = vector.broadcast %3 : vector<1x64xf32> to vector<128x64xf32>
    %38 = arith.mulf %36, %37 : vector<128x64xf32>
    %39 = vector.broadcast %4 : vector<1x64xf32> to vector<128x64xf32>
    %40 = arith.addf %38, %39 : vector<128x64xf32>
    %c0_26 = arith.constant 0 : index
    %c0_27 = arith.constant 0 : index
    %41 = vector.load %arg6[%c0_26, %c0_27] : memref<64x32xf32, #tpu.memory_space<vmem>>, vector<64x32xf32>
    %cst_28 = arith.constant dense<0.000000e+00> : vector<128x32xf32>
    %42 = tpu.matmul %40, %41, %cst_28 {dimension_numbers = #tpu.dot_dimension_numbers<[1], [0], [0], [1], [0, 0, 1, 1], [], []>} : vector<128x64xf32>, vector<64x32xf32>, vector<128x32xf32> -> vector<128x32xf32>
    %43 = vector.broadcast %5 : vector<1x32xf32> to vector<128x32xf32>
    %44 = arith.addf %42, %43 : vector<128x32xf32>
    %cst_29 = arith.constant 0.000000e+00 : f32
    %45 = vector.broadcast %cst_29 : f32 to vector<128x32xf32>
    %46 = arith.maximumf %44, %45 : vector<128x32xf32>
    %cst_30 = arith.constant dense<0.000000e+00> : vector<128xf32>
    %47 = vector.multi_reduction <add>, %46, %cst_30 [1] : vector<128x32xf32> to vector<128xf32>
    %48 = vector.shape_cast %47 : vector<128xf32> to vector<128x1xf32>
    %cst_31 = arith.constant 3.200000e+01 : f32
    %49 = vector.broadcast %cst_31 : f32 to vector<128x1xf32>
    %50 = arith.divf %48, %49 : vector<128x1xf32>
    %51 = arith.mulf %46, %46 : vector<128x32xf32>
    %cst_32 = arith.constant dense<0.000000e+00> : vector<128xf32>
    %52 = vector.multi_reduction <add>, %51, %cst_32 [1] : vector<128x32xf32> to vector<128xf32>
    %53 = vector.shape_cast %52 : vector<128xf32> to vector<128x1xf32>
    %cst_33 = arith.constant 3.200000e+01 : f32
    %54 = vector.broadcast %cst_33 : f32 to vector<128x1xf32>
    %55 = arith.divf %53, %54 : vector<128x1xf32>
    %56 = arith.mulf %50, %50 : vector<128x1xf32>
    %57 = arith.subf %55, %56 : vector<128x1xf32>
    %58 = vector.broadcast %50 : vector<128x1xf32> to vector<128x32xf32>
    %59 = arith.subf %46, %58 : vector<128x32xf32>
    %cst_34 = arith.constant 9.99999974E-6 : f32
    %60 = vector.broadcast %cst_34 : f32 to vector<128x1xf32>
    %61 = arith.addf %57, %60 : vector<128x1xf32>
    %62 = math.rsqrt %61 : vector<128x1xf32>
    %63 = vector.broadcast %62 : vector<128x1xf32> to vector<128x32xf32>
    %64 = arith.mulf %59, %63 : vector<128x32xf32>
    %65 = vector.broadcast %6 : vector<1x32xf32> to vector<128x32xf32>
    %66 = arith.mulf %64, %65 : vector<128x32xf32>
    %67 = vector.broadcast %7 : vector<1x32xf32> to vector<128x32xf32>
    %68 = arith.addf %66, %67 : vector<128x32xf32>
    %69 = vector.broadcast %8 : vector<1x32xf32> to vector<128x32xf32>
    %70 = arith.mulf %68, %69 : vector<128x32xf32>
    %cst_35 = arith.constant dense<0.000000e+00> : vector<128xf32>
    %71 = vector.multi_reduction <add>, %70, %cst_35 [1] : vector<128x32xf32> to vector<128xf32>
    %72 = vector.shape_cast %71 : vector<128xf32> to vector<128x1xf32>
    %73 = vector.broadcast %9 : vector<1x1xf32> to vector<128x1xf32>
    %74 = arith.addf %72, %73 : vector<128x1xf32>
    %75 = vector.shape_cast %74 : vector<128x1xf32> to vector<1x128xf32>
    %c0_36 = arith.constant 0 : index
    %c0_37 = arith.constant 0 : index
    %76 = vector.load %arg8[%c0_36, %c0_37] : memref<1x128xf32, #tpu.memory_space<vmem>>, vector<1x128xf32>
    tpu.vector_store %arg8[%c0_36, %c0_37], %75 {strides = array<i32>} : memref<1x128xf32, #tpu.memory_space<vmem>>, vector<1x128xf32>,
    return
  }
  func.func @transform_0(%arg0: i32) -> (i32, i32) {
    %c0_i32 = arith.constant 0 : i32
    %c0_i32_0 = arith.constant 0 : i32
    return %arg0, %c0_i32 : i32, i32
  }
  func.func @transform_1(%arg0: i32) -> (i32, i32) {
    %c0_i32 = arith.constant 0 : i32
    %c0_i32_0 = arith.constant 0 : i32
    return %arg0, %c0_i32 : i32, i32
  }
  func.func @transform_2(%arg0: i32) -> (i32, i32) {
    %c0_i32 = arith.constant 0 : i32
    %c0_i32_0 = arith.constant 0 : i32
    %c0_i32_1 = arith.constant 0 : i32
    return %c0_i32, %c0_i32_0 : i32, i32
  }
  func.func @transform_3(%arg0: i32) -> (i32, i32) {
    %c0_i32 = arith.constant 0 : i32
    %c0_i32_0 = arith.constant 0 : i32
    %c0_i32_1 = arith.constant 0 : i32
    return %c0_i32, %c0_i32_0 : i32, i32
  }
  func.func @transform_4(%arg0: i32) -> (i32, i32) {
    %c0_i32 = arith.constant 0 : i32
    %c0_i32_0 = arith.constant 0 : i32
    %c0_i32_1 = arith.constant 0 : i32
    return %c0_i32, %c0_i32_0 : i32, i32
  }
  func.func @transform_5(%arg0: i32) -> (i32, i32) {
    %c0_i32 = arith.constant 0 : i32
    %c0_i32_0 = arith.constant 0 : i32
    %c0_i32_1 = arith.constant 0 : i32
    return %c0_i32, %c0_i32_0 : i32, i32
  }
  func.func @transform_6(%arg0: i32) -> (i32, i32) {
    %c0_i32 = arith.constant 0 : i32
    %c0_i32_0 = arith.constant 0 : i32
    %c0_i32_1 = arith.constant 0 : i32
    return %c0_i32, %c0_i32_0 : i32, i32
  }
  func.func @transform_7(%arg0: i32) -> (i32, i32) {
    %c0_i32 = arith.constant 0 : i32
    %c0_i32_0 = arith.constant 0 : i32
    return %c0_i32, %arg0 : i32, i32
  }
}

</mosaic_0001>

<bundles_post_ra>
// kernel: tpu_custom_call.1
= control target key start
LH: loop header
LB: loop body
LE: loop exit
PB: predicated region body
PF: predicated region fallthrough
CT: control target
= control target key end

     0   :  { %vm119_vm0 = vcmask 1043456   ;;  %vm70_vm1 = vcmask 31744   ;;  %s2721_s0 = inlined_call_operand.vmem [shape: f32[128,16], index: 0, kind: input, shape index: {}]   ;;  %s2722_s1 = inlined_call_operand.vmem [shape: f32[128,4], index: 1, kind: input, shape index: {}]   ;;  %s2723_s2 = inlined_call_operand.vmem [shape: f32[16,64], index: 2, kind: input, shape index: {}]   ;;  %s2724_s3 = inlined_call_operand.vmem [shape: f32[4,64], index: 3, kind: input, shape index: {}]   ;;  %s2725_s4 = inlined_call_operand.vmem [shape: f32[3,64], index: 4, kind: input, shape index: {}]   ;;  %s2726_s5 = inlined_call_operand.vmem [shape: f32[64,32], index: 5, kind: input, shape index: {}]   ;;  %s2727_s6 = inlined_call_operand.vmem [shape: f32[5,32], index: 6, kind: input, shape index: {}]   ;;  %s2728_s7 = inlined_call_operand.hbm [shape: f32[1,128], index: 7, kind: output, shape index: {}]  }
   0x1   :  { %v69_v0 = vld [vmem:[%s2724_s3] sm:$0xf]  ;;  %v44_v2 = vld [vmem:[%s2722_s1 + $0x8] sm:$0xff]  ;;  %v45_v5 = vld [vmem:[%s2722_s1 + $0x10] sm:$0xff] }
   0x2   :  { %v43_v1 = vld [vmem:[%s2722_s1] sm:$0xff]  ;;  %1678 = vmatprep.subr.msk.mxu0 %vm119_vm0, %v69_v0  ;;  %v68_v4 = vld [vmem:[%s2723_s2 + $0x8] sm:$0xff]  ;;  %1792 = vmatprep.subr.msk.mxu1 %vm119_vm0, %v69_v0  ;;  %v46_v7 = vld [vmem:[%s2722_s1 + $0x18] sm:$0xff] }
   0x3   :  { %1680 = vmatprep.mubr.msk.f32.mxu0 %vm70_vm1, %v43_v1  ;;  %v67_v3 = vld [vmem:[%s2723_s2] sm:$0xff]  ;;  %1679 = vmatpush3.msk.msra.mxu0 %vm119_vm0, %v69_v0  ;;  %v52_v10 = vld [vmem:[%s2722_s1 + $0x48] sm:$0xff]  ;;  %v53_v11 = vld [vmem:[%s2722_s1 + $0x50] sm:$0xff] }
   0x4   :  { %v1772_v6 = vpack.c.bf16 %v68_v4, %v67_v3  ;;  %1681 = vmatmul.mubr.msk.f32.vlgmr.msra.gmra.mrb[0].mxu0 %vm70_vm1, %v44_v2  ;;  %1793 = vmatpush3.msk.msra.mxu1 %vm119_vm0, %v69_v0  ;;  %v47_v8 = vld [vmem:[%s2722_s1 + $0x20] sm:$0xff]  ;;  %v48_v12 = vld [vmem:[%s2722_s1 + $0x28] sm:$0xff]  ;;  %v49_v13 = vld [vmem:[%s2722_s1 + $0x30] sm:$0xff] }
   0x5   :  { %1683 = vmatprep.mubr.msk.f32.mxu0 %vm70_vm1, %v45_v5  ;;  %v51_v9 = vld [vmem:[%s2722_s1 + $0x40] sm:$0xff]  ;;  %v54_v14 = vld [vmem:[%s2722_s1 + $0x58] sm:$0xff] }
   0x6   :  { %1773 = vmatprep.subr.bf16.mxu0 %v1772_v6  ;;  %1692 = vmatprep.mubr.msk.f32.mxu1 %vm70_vm1, %v51_v9  ;;  %v55_v15 = vld [vmem:[%s2722_s1 + $0x60] sm:$0xff]  ;;  %v50_v16 = vld [vmem:[%s2722_s1 + $0x38] sm:$0xff] }
   0x7   :  { %1775 = vmatpush3.bf16.msra.mxu0 %v1772_v6  ;;  %1693 = vmatmul.mubr.msk.f32.vlgmr.msra.gmra.mrb[0].mxu1 %vm70_vm1, %v52_v10 }
   0x8   :  { %1684 = vmatmul.mubr.msk.f32.gmra.mrb[2].mxu0 %vm70_vm1, %v46_v7  ;;  %1695 = vmatprep.mubr.msk.f32.mxu1 %vm70_vm1, %v53_v11 }
   0x9   :  { %1686 = vmatprep.mubr.msk.f32.mxu0 %vm70_vm1, %v47_v8 }
   0xb   :  { %1696 = vmatmul.mubr.msk.f32.gmra.mrb[2].mxu1 %vm70_vm1, %v54_v14 }
   0xc   :  { %1687 = vmatmul.mubr.msk.f32.gmra.mrb[4].mxu0 %vm70_vm1, %v48_v12 }
   0xd   :  { %1689 = vmatprep.mubr.msk.f32.mxu0 %vm70_vm1, %v49_v13 }
   0xe   :  { %12 = vsyncpa [#allocation3], 0  ;;  %v27_v17 = vld [vmem:[%s2721_s0] sm:$0xff]  ;;  %vm268_vm2 = vcmask 130048   ;;  %1698 = vmatprep.mubr.msk.f32.mxu1 %vm70_vm1, %v55_v15  ;;  %v56_v18 = vld [vmem:[%s2722_s1 + $0x68] sm:$0xff]  ;;  %vm498_vm3 = vcmask 523264  }
   0xf   :  { %v57_v19 = vld [vmem:[%s2722_s1 + $0x70] sm:$0xff]  ;;  %v28_v20 = vld [vmem:[%s2721_s0 + $0x8] sm:$0xff]  ;;  %1699 = vmatmul.mubr.msk.f32.gmra.mrb[4].mxu1 %vm70_vm1, %v56_v18  ;;  %v58_v22 = vld [vmem:[%s2722_s1 + $0x78] sm:$0xff]  ;;  %vm1001_vm4 = vcmask 261120   ;;  %vm1446_vm5 = vcmask 130112   ;;  %vm1453_vm6 = vcmask 195712  }
  0x10   :  { %1690 = vmatmul.mubr.msk.f32.gmra.mrb[6].mxu0 %vm70_vm1, %v50_v16  ;;  %v29_v21 = vld [vmem:[%s2721_s0 + $0x10] sm:$0xff]  ;;  %1701 = vmatprep.mubr.msk.f32.mxu1 %vm70_vm1, %v57_v19  ;;  %v30_v23 = vld [vmem:[%s2721_s0 + $0x18] sm:$0xff]  ;;  %v31_v24 = vld [vmem:[%s2721_s0 + $0x20] sm:$0xff]  ;;  %vm1460_vm7 = vcmask 261312   ;;  %vm1467_vm8 = vcmask 326912   ;;  %vm1474_vm9 = vcmask 392512  }
  0x11   :  { %1708 = vmatprep.mubr.msk.f32.mxu0 %vm268_vm2, %v27_v17  ;;  %v32_v25 = vld [vmem:[%s2721_s0 + $0x28] sm:$0xff]  ;;  %v33_v26 = vld [vmem:[%s2721_s0 + $0x30] sm:$0xff]  ;;  %v34_v27 = vld [vmem:[%s2721_s0 + $0x38] sm:$0xff]  ;;  %vm1481_vm10 = vcmask 458112   ;;  %vm1488_vm11 = vcmask 523712   ;;  %vm1495_vm12 = vcmask 589312  }
  0x12   :  { %v35_v28 = vld [vmem:[%s2721_s0 + $0x40] sm:$0xff]  ;;  %v36_v29 = vld [vmem:[%s2721_s0 + $0x48] sm:$0xff]  ;;  %v37_v30 = vld [vmem:[%s2721_s0 + $0x50] sm:$0xff]  ;;  %vm1502_vm13 = vcmask 654912   ;;  %vm1509_vm14 = vcmask 720512   ;;  %vm1516_vm15 = vcmask 786112  }
  0x13   :  { %1702 = vmatmul.mubr.msk.f32.gmra.mrb[6].mxu1 %vm70_vm1, %v58_v22  ;;  %v38_v31 = vld [vmem:[%s2721_s0 + $0x58] sm:$0xff]  ;;  %v39_v32 = vld [vmem:[%s2721_s0 + $0x60] sm:$0xff]  ;;  %v40_v33 = vld [vmem:[%s2721_s0 + $0x68] sm:$0xff]  ;;  %vm1523_vm0 = vcmask 851712   ;;  %vm1530_vm1 = vcmask 917312  }
  0x14   :  { %1709 = vmatmul.mubr.msk.f32.vlgmr.msra.gmra.mrb[0].mxu0 %vm268_vm2, %v28_v20  ;;  %v41_v34 = vld [vmem:[%s2721_s0 + $0x70] sm:$0xff]  ;;  %v42_v35 = vld [vmem:[%s2721_s0 + $0x78] sm:$0xff]  ;;  %v2086_v41 = vld [vmem:[%s2725_s4] ss:$0 sm:$0xff] }
  0x15   :  { %1711 = vmatprep.mubr.msk.f32.mxu0 %vm268_vm2, %v29_v21 }
  0x18   :  { %1712 = vmatmul.mubr.msk.f32.gmra.mrb[2].mxu0 %vm268_vm2, %v30_v23 }
  0x19   :  { %1714 = vmatprep.mubr.msk.f32.mxu0 %vm268_vm2, %v31_v24 }
  0x1c   :  { %1715 = vmatmul.mubr.msk.f32.gmra.mrb[4].mxu0 %vm268_vm2, %v32_v25 }
  0x1d   :  { %1717 = vmatprep.mubr.msk.f32.mxu0 %vm268_vm2, %v33_v26 }
  0x20   :  { %1718 = vmatmul.mubr.msk.f32.gmra.mrb[6].mxu0 %vm268_vm2, %v34_v27 }
  0x21   :  { %1720 = vmatprep.mubr.msk.f32.mxu0 %vm268_vm2, %v35_v28 }
  0x24   :  { %1721 = vmatmul.mubr.msk.f32.gmra.mrb[8].mxu0 %vm268_vm2, %v36_v29 }
  0x25   :  { %1723 = vmatprep.mubr.msk.f32.mxu0 %vm268_vm2, %v37_v30 }
  0x28   :  { %1724 = vmatmul.mubr.msk.f32.gmra.mrb[10].mxu0 %vm268_vm2, %v38_v31 }
  0x29   :  { %1726 = vmatprep.mubr.msk.f32.mxu0 %vm268_vm2, %v39_v32 }
  0x2c   :  { %1727 = vmatmul.mubr.msk.f32.gmra.mrb[12].mxu0 %vm268_vm2, %v40_v33 }
  0x2d   :  { %1729 = vmatprep.mubr.msk.f32.mxu0 %vm268_vm2, %v41_v34 }
  0x30   :  { %1730 = vmatmul.mubr.msk.f32.gmra.mrb[14].mxu0 %vm268_vm2, %v42_v35  ;;  %vm1537_vm2 = vcmask 982912  }
  0xda   :  { %v1694_v36 = vpop.f32.mrb[0].mxu1 }
  0xdb   :  { %v229_v37 = vpop.f32.mrb[1].mxu1 }
  0xde   :  { %v1697_v38 = vpop.f32.mrb[2].mxu1 }
  0xdf   :  { %v239_v39 = vpop.f32.mrb[3].mxu1 }
  0xe2   :  { %v2081_v40 = vpop.f32.mrb[4].mxu1 }
  0xe3   :  { %v2088_v42 = vpop.f32.mrb[5].mxu1 }
  0xe6   :  { %v2091_v46 = vpop.f32.mrb[6].mxu1 }
  0xe7   :  { %v1710_v43 = vpop.f32.mrb[0].mxu0  ;;  %v2094_v48 = vpop.f32.mrb[7].mxu1 }
  0xe8   :  { %v467_v44 = vadd.f32 %v1710_v43, %v2086_v41  ;;  %v383_v45 = vpop.f32.mrb[1].mxu0 }
  0xe9   :  { %v466_v47 = vadd.f32 %v2086_v41, %v383_v45 }
  0xea   :  { %v2096_v49 = vmax.f32 %v467_v44, 0.0 }
  0xeb   :  { %v2098_v50 = vmax.f32 %v466_v47, 0.0  ;;  %v1713_v51 = vpop.f32.mrb[2].mxu0 }
  0xec   :  { %v393_v52 = vpop.f32.mrb[3].mxu0  ;;  %v502_v53 = vsel %vm498_vm3, %v2096_v49, 0.0  ;;  %v565_v54 = vmul.f32 %v2096_v49, %v2096_v49  ;;  %v469_v56 = vadd.f32 %v1713_v51, %v2086_v41  ;;  %v780_v51 = vld [vmem:[%s2726_s5] sm:$0xff] }
  0xed   :  { %v468_v55 = vadd.f32 %v2086_v41, %v393_v52  ;;  %503 = vadd.xlane.f32.xlu0 %v502_v53  ;;  %v564_v58 = vmul.f32 %v2098_v50, %v2098_v50  ;;  %v499_v62 = vsel %vm498_vm3, %v2098_v50, 0.0 }
  0xee   :  { %v583_v57 = vsel %vm498_vm3, %v565_v54, 0.0  ;;  %v2113_v63 = vmax.f32 %v469_v56, 0.0 }
  0xef   :  { %584 = vadd.xlane.f32.xlu1 %v583_v57  ;;  %v1716_v59 = vpop.f32.mrb[4].mxu0  ;;  %v2109_v60 = vmax.f32 %v468_v55, 0.0  ;;  %v580_v0 = vsel %vm498_vm3, %v564_v58, 0.0  ;;  %v782_v57 = vld [vmem:[%s2726_s5 + $0x10] sm:$0xff]  ;;  %v783_v58 = vld [vmem:[%s2726_s5 + $0x18] sm:$0xff] }
  0xf0   :  { %v403_v61 = vpop.f32.mrb[5].mxu0  ;;  %v471_v6 = vadd.f32 %v1716_v59, %v2086_v41  ;;  %v508_v7 = vsel %vm498_vm3, %v2113_v63, 0.0  ;;  %v567_v8 = vmul.f32 %v2113_v63, %v2113_v63 }
  0xf1   :  { %500 = vadd.xlane.f32.xlu0 %v499_v62  ;;  %v470_v2 = vadd.f32 %v2086_v41, %v403_v61  ;;  %v505_v4 = vsel %vm498_vm3, %v2109_v60, 0.0  ;;  %v566_v5 = vmul.f32 %v2109_v60, %v2109_v60  ;;  %v1780_v61 = vpack.c.bf16 %v783_v58, %v782_v57 }
  0xf2   :  { %v2129_v15 = vmax.f32 %v471_v6, 0.0  ;;  %v589_v16 = vsel %vm498_vm3, %v567_v8, 0.0 }
  0xf3   :  { %581 = vadd.xlane.f32.xlu1 %v580_v0  ;;  %v1719_v1 = vpop.f32.mrb[6].mxu0  ;;  %v2126_v10 = vmax.f32 %v470_v2, 0.0  ;;  %v586_v11 = vsel %vm498_vm3, %v566_v5, 0.0 }
  0xf4   :  { %v413_v3 = vpop.f32.mrb[7].mxu0  ;;  %v473_v24 = vadd.f32 %v1719_v1, %v2086_v41  ;;  %v514_v25 = vsel %vm498_vm3, %v2129_v15, 0.0  ;;  %v569_v26 = vmul.f32 %v2129_v15, %v2129_v15 }
  0xf5   :  { %506 = vadd.xlane.f32.xlu0 %v505_v4  ;;  %v472_v18 = vadd.f32 %v2086_v41, %v413_v3  ;;  %v511_v19 = vsel %vm498_vm3, %v2126_v10, 0.0  ;;  %v568_v20 = vmul.f32 %v2126_v10, %v2126_v10  ;;  %v784_v3 = vld [vmem:[%s2726_s5 + $0x20] sm:$0xff]  ;;  %v785_v4 = vld [vmem:[%s2726_s5 + $0x28] sm:$0xff] }
  0xf6   :  { %v2147_v33 = vmax.f32 %v473_v24, 0.0  ;;  %v595_v34 = vsel %vm498_vm3, %v569_v26, 0.0  ;;  %v1784_v6 = vpack.c.bf16 %v785_v4, %v784_v3 }
  0xf7   :  { %509 = vadd.xlane.f32.xlu1 %v508_v7  ;;  %v1722_v9 = vpop.f32.mrb[8].mxu0  ;;  %v2142_v28 = vmax.f32 %v472_v18, 0.0  ;;  %v592_v29 = vsel %vm498_vm3, %v568_v20, 0.0 }
  0xf8   :  { %v429_v12 = vadd.f32 %v1722_v9, %v1694_v36  ;;  %v423_v13 = vpop.f32.mrb[9].mxu0  ;;  %v520_v45 = vsel %vm498_vm3, %v2147_v33, 0.0  ;;  %v571_v47 = vmul.f32 %v2147_v33, %v2147_v33 }
  0xf9   :  { %587 = vadd.xlane.f32.xlu0 %v586_v11  ;;  %v424_v14 = vadd.f32 %v423_v13, %v229_v37  ;;  %v517_v37 = vsel %vm498_vm3, %v2142_v28, 0.0  ;;  %v787_v13 = vld [vmem:[%s2726_s5 + $0x38] sm:$0xff] }
  0xfa   :  { %v475_v43 = vadd.f32 %v2086_v41, %v429_v12  ;;  %v601_v54 = vsel %vm498_vm3, %v571_v47, 0.0  ;;  %v786_v12 = vld [vmem:[%s2726_s5 + $0x30] sm:$0xff] }
  0xfb   :  { %590 = vadd.xlane.f32.xlu1 %v589_v16  ;;  %v1725_v17 = vpop.f32.mrb[10].mxu0  ;;  %v474_v35 = vadd.f32 %v2086_v41, %v424_v14  ;;  %v1788_v16 = vpack.c.bf16 %v787_v13, %v786_v12 }
  0xfc   :  { %v439_v21 = vadd.f32 %v1725_v17, %v1697_v38  ;;  %v433_v22 = vpop.f32.mrb[11].mxu0  ;;  %v570_v38 = vmul.f32 %v2142_v28, %v2142_v28  ;;  %v2173_v53 = vmax.f32 %v475_v43, 0.0 }
  0xfd   :  { %512 = vadd.xlane.f32.xlu0 %v511_v19  ;;  %v434_v23 = vadd.f32 %v433_v22, %v239_v39  ;;  %v2160_v44 = vmax.f32 %v474_v35, 0.0 }
  0xfe   :  { %v598_v52 = vsel %vm498_vm3, %v570_v38, 0.0  ;;  %v477_v62 = vadd.f32 %v2086_v41, %v439_v21  ;;  %v526_v1 = vsel %vm498_vm3, %v2173_v53, 0.0  ;;  %v573_v2 = vmul.f32 %v2173_v53, %v2173_v53 }
  0xff   :  { %515 = vadd.xlane.f32.xlu1 %v514_v25  ;;  %v1728_v27 = vpop.f32.mrb[12].mxu0  ;;  %v476_v55 = vadd.f32 %v2086_v41, %v434_v23  ;;  %v523_v56 = vsel %vm498_vm3, %v2160_v44, 0.0  ;;  %v572_v59 = vmul.f32 %v2160_v44, %v2160_v44 }
 0x100   :  { %v449_v30 = vadd.f32 %v1728_v27, %v2081_v40  ;;  %v443_v31 = vpop.f32.mrb[13].mxu0  ;;  %v2201_v7 = vmax.f32 %v477_v62, 0.0  ;;  %v607_v8 = vsel %vm498_vm3, %v573_v2, 0.0 }
 0x101   :  { %593 = vadd.xlane.f32.xlu0 %v592_v29  ;;  %v444_v32 = vadd.f32 %v443_v31, %v2088_v42  ;;  %v2188_v0 = vmax.f32 %v476_v55, 0.0  ;;  %v604_v5 = vsel %vm498_vm3, %v572_v59, 0.0 }
 0x102   :  { %v479_v17 = vadd.f32 %v2086_v41, %v449_v30  ;;  %v532_v19 = vsel %vm498_vm3, %v2201_v7, 0.0  ;;  %v575_v20 = vmul.f32 %v2201_v7, %v2201_v7 }
 0x103   :  { %596 = vadd.xlane.f32.xlu1 %v595_v34  ;;  %v1731_v36 = vpop.f32.mrb[14].mxu0  ;;  %v478_v9 = vadd.f32 %v2086_v41, %v444_v32  ;;  %v529_v11 = vsel %vm498_vm3, %v2188_v0, 0.0  ;;  %v574_v14 = vmul.f32 %v2188_v0, %v2188_v0 }
 0x104   :  { %v2156_v39 = vadd.f32 %v1731_v36, %v2091_v46  ;;  %v453_v40 = vpop.f32.mrb[15].mxu0  ;;  %v781_v46 = vld [vmem:[%s2726_s5 + $0x8] sm:$0xff]  ;;  %v2223_v22 = vmax.f32 %v479_v17, 0.0  ;;  %v613_v23 = vsel %vm498_vm3, %v575_v20, 0.0 }
 0x105   :  { %518 = vadd.xlane.f32.xlu0 %v517_v37  ;;  %v454_v42 = vadd.f32 %v453_v40, %v2094_v48  ;;  %v1776_v48 = vpack.c.bf16 %v781_v46, %v780_v51  ;;  %v2216_v18 = vmax.f32 %v478_v9, 0.0  ;;  %v610_v21 = vsel %vm498_vm3, %v574_v14, 0.0 }
 0x106   :  { %v481_v27 = vadd.f32 %v2086_v41, %v2156_v39  ;;  %v538_v30 = vsel %vm498_vm3, %v2223_v22, 0.0  ;;  %v577_v31 = vmul.f32 %v2223_v22, %v2223_v22 }
 0x107   :  { %521 = vadd.xlane.f32.xlu1 %v520_v45  ;;  %1777 = vmatprep.subr.bf16.mxu1 %v1776_v48  ;;  %v480_v24 = vadd.f32 %v2086_v41, %v454_v42  ;;  %v535_v25 = vsel %vm498_vm3, %v2216_v18, 0.0  ;;  %v576_v26 = vmul.f32 %v2216_v18, %v2216_v18 }
 0x108   :  { %1779 = vmatpush3.bf16.msra.mxu1 %v1776_v48  ;;  %v2240_v34 = vmax.f32 %v481_v27, 0.0  ;;  %v619_v35 = vsel %vm498_vm3, %v577_v31, 0.0 }
 0x109   :  { %599 = vadd.xlane.f32.xlu0 %v598_v52  ;;  %1781 = vmatprep.subr.bf16.mxu1 %v1780_v61  ;;  %v2233_v29 = vmax.f32 %v480_v24, 0.0  ;;  %v616_v32 = vsel %vm498_vm3, %v576_v26, 0.0 }
 0x10a   :  { %v544_v37 = vsel %vm498_vm3, %v2240_v34, 0.0  ;;  %v579_v38 = vmul.f32 %v2240_v34, %v2240_v34 }
 0x10b   :  { %602 = vadd.xlane.f32.xlu1 %v601_v54  ;;  %v541_v36 = vsel %vm498_vm3, %v2233_v29, 0.0  ;;  %v578_v41 = vmul.f32 %v2233_v29, %v2233_v29 }
 0x10c   :  { %1783 = vmatpush3.bf16.msra.mxu1 %v1780_v61  ;;  %v625_v40 = vsel %vm498_vm3, %v579_v38, 0.0 }
 0x10d   :  { %524 = vadd.xlane.f32.xlu0 %v523_v56  ;;  %1785 = vmatprep.subr.bf16.mxu1 %v1784_v6  ;;  %v622_v39 = vsel %vm498_vm3, %v578_v41, 0.0 }
 0x10f   :  { %527 = vadd.xlane.f32.xlu1 %v526_v1 }
 0x110   :  { %1787 = vmatpush3.bf16.msra.mxu1 %v1784_v6 }
 0x111   :  { %605 = vadd.xlane.f32.xlu0 %v604_v5  ;;  %1789 = vmatprep.subr.bf16.mxu1 %v1788_v16 }
 0x113   :  { %608 = vadd.xlane.f32.xlu1 %v607_v8 }
 0x114   :  { %1791 = vmatpush3.bf16.msra.mxu1 %v1788_v16 }
 0x115   :  { %530 = vadd.xlane.f32.xlu0 %v529_v11 }
 0x117   :  { %533 = vadd.xlane.f32.xlu1 %v532_v19 }
 0x119   :  { %611 = vadd.xlane.f32.xlu0 %v610_v21 }
 0x11b   :  { %614 = vadd.xlane.f32.xlu1 %v613_v23 }
 0x11d   :  { %536 = vadd.xlane.f32.xlu0 %v535_v25 }
 0x11f   :  { %539 = vadd.xlane.f32.xlu1 %v538_v30  ;;  %v2267_v30 = vld [vmem:[%s2725_s4 + $0x1] ss:$0 sm:$0xff] }
 0x121   :  { %617 = vadd.xlane.f32.xlu0 %v616_v32 }
 0x123   :  { %620 = vadd.xlane.f32.xlu1 %v619_v35 }
 0x125   :  { %542 = vadd.xlane.f32.xlu0 %v541_v36 }
 0x127   :  { %545 = vadd.xlane.f32.xlu1 %v544_v37 }
 0x129   :  { %623 = vadd.xlane.f32.xlu0 %v622_v39 }
 0x12b   :  { %626 = vadd.xlane.f32.xlu1 %v625_v40 }
 0x17a   :  { %v504_v42 = vpop.xlane.xlu0 %503 }
 0x17b   :  { %v549_v43 = vmul.f32 0.015625, %v504_v42 }
 0x17c   :  { %v585_v45 = vpop.xlane.xlu1 %584 }
 0x17d   :  { %v645_v47 = vmul.f32 %v549_v43, %v549_v43  ;;  %v629_v51 = vmul.f32 0.015625, %v585_v45  ;;  %v677_v20 = vsub.f32 %v2096_v49, %v549_v43 }
 0x17e   :  { %v501_v46 = vpop.xlane.xlu0 %500 }
 0x17f   :  { %v661_v48 = vsub.f32 %v629_v51, %v645_v47  ;;  %v548_v52 = vmul.f32 0.015625, %v501_v46 }
 0x180   :  { %v582_v54 = vpop.xlane.xlu1 %581 }
 0x181   :  { %v693_v55 = vadd.f32 1e-05, %v661_v48  ;;  %v644_v56 = vmul.f32 %v548_v52, %v548_v52  ;;  %v628_v57 = vmul.f32 0.015625, %v582_v54  ;;  %v676_v31 = vsub.f32 %v2098_v50, %v548_v52  ;;  %v2278_v50 = vld [vmem:[%s2725_s4 + $0x2] ss:$0 sm:$0xff] }
 0x182   :  { %v507_v58 = vpop.xlane.xlu0 %506 }
 0x183   :  { %1814 = vrsqrt.f32 %v693_v55  ;;  %v660_v59 = vsub.f32 %v628_v57, %v644_v56  ;;  %v550_v61 = vmul.f32 0.015625, %v507_v58 }
 0x184   :  { %v510_v62 = vpop.xlane.xlu1 %509 }
 0x185   :  { %v692_v1 = vadd.f32 1e-05, %v660_v59  ;;  %v2253_v2 = vmul.f32 0.015625, %v510_v62  ;;  %v646_v4 = vmul.f32 %v550_v61, %v550_v61  ;;  %v678_v46 = vsub.f32 %v2109_v60, %v550_v61 }
 0x186   :  { %v588_v3 = vpop.xlane.xlu0 %587 }
 0x187   :  { %1816 = vrsqrt.f32 %v692_v1  ;;  %v630_v5 = vmul.f32 0.015625, %v588_v3  ;;  %v647_v8 = vmul.f32 %v2253_v2, %v2253_v2  ;;  %v679_v59 = vsub.f32 %v2113_v63, %v2253_v2 }
 0x188   :  { %v591_v6 = vpop.xlane.xlu1 %590 }
 0x189   :  { %v662_v9 = vsub.f32 %v630_v5, %v646_v4  ;;  %v631_v11 = vmul.f32 0.015625, %v591_v6 }
 0x18a   :  { %v513_v12 = vpop.xlane.xlu0 %512 }
 0x18b   :  { %v694_v13 = vadd.f32 1e-05, %v662_v9  ;;  %v663_v14 = vsub.f32 %v631_v11, %v647_v8  ;;  %v2257_v16 = vmul.f32 0.015625, %v513_v12 }
 0x18c   :  { %v516_v17 = vpop.xlane.xlu1 %515 }
 0x18d   :  { %v1815_v19 = vpop.eup %1814  ;;  %1818 = vrsqrt.f32 %v694_v13  ;;  %v695_v21 = vadd.f32 1e-05, %v663_v14  ;;  %v2260_v23 = vmul.f32 0.015625, %v516_v17  ;;  %v648_v26 = vmul.f32 %v2257_v16, %v2257_v16 }
 0x18e   :  { %v594_v24 = vpop.xlane.xlu0 %593  ;;  %v725_v25 = vmul.f32 %v1815_v19, %v677_v20  ;;  %v680_v17 = vsub.f32 %v2126_v10, %v2257_v16 }
 0x18f   :  { %1820 = vrsqrt.f32 %v695_v21  ;;  %v632_v27 = vmul.f32 0.015625, %v594_v24  ;;  %v649_v35 = vmul.f32 %v2260_v23, %v2260_v23 }
 0x190   :  { %v597_v32 = vpop.xlane.xlu1 %596  ;;  %v745_v39 = vmul.f32 %v2267_v30, %v725_v25 }
 0x191   :  { %v1817_v49 = vpop.eup %1816  ;;  %v664_v36 = vsub.f32 %v632_v27, %v648_v26  ;;  %v633_v41 = vmul.f32 0.015625, %v597_v32  ;;  %v681_v27 = vsub.f32 %v2129_v15, %v2260_v23 }
 0x192   :  { %v519_v37 = vpop.xlane.xlu0 %518  ;;  %v724_v38 = vmul.f32 %v1817_v49, %v676_v31  ;;  %v765_v58 = vadd.f32 %v2278_v50, %v745_v39 }
 0x193   :  { %v696_v40 = vadd.f32 1e-05, %v664_v36  ;;  %v665_v42 = vsub.f32 %v633_v41, %v649_v35  ;;  %v2273_v43 = vmul.f32 0.015625, %v519_v37 }
 0x194   :  { %v522_v45 = vpop.xlane.xlu1 %521  ;;  %v744_v47 = vmul.f32 %v2267_v30, %v724_v38 }
 0x195   :  { %1822 = vrsqrt.f32 %v696_v40  ;;  %v697_v51 = vadd.f32 1e-05, %v665_v42  ;;  %v2282_v48 = vmul.f32 0.015625, %v522_v45  ;;  %v650_v56 = vmul.f32 %v2273_v43, %v2273_v43 }
 0x196   :  { %v600_v52 = vpop.xlane.xlu0 %599  ;;  %v764_v54 = vadd.f32 %v2278_v50, %v744_v47  ;;  %v682_v47 = vsub.f32 %v2142_v28, %v2273_v43 }
 0x197   :  { %v1819_v55 = vpop.eup %1818  ;;  %1824 = vrsqrt.f32 %v697_v51  ;;  %v634_v57 = vmul.f32 0.015625, %v600_v52  ;;  %v651_v1 = vmul.f32 %v2282_v48, %v2282_v48 }
 0x198   :  { %1748 = vmatprep.mubr.msk.f32.mxu1 %vm498_vm3, %v764_v54  ;;  %v603_v62 = vpop.xlane.xlu1 %602  ;;  %v726_v60 = vmul.f32 %v1819_v55, %v678_v46 }
 0x199   :  { %v1821_v61 = vpop.eup %1820  ;;  %v666_v3 = vsub.f32 %v634_v57, %v650_v56  ;;  %v635_v4 = vmul.f32 0.015625, %v603_v62  ;;  %1749 = vmatmul.mubr.msk.f32.vlgmr.msra.gmra.mrb[8].mxu1 %vm498_vm3, %v765_v58  ;;  %v683_v57 = vsub.f32 %v2147_v33, %v2282_v48 }
 0x19a   :  { %v525_v5 = vpop.xlane.xlu0 %524  ;;  %v746_v6 = vmul.f32 %v2267_v30, %v726_v60  ;;  %v727_v8 = vmul.f32 %v1821_v61, %v679_v59 }
 0x19b   :  { %v698_v9 = vadd.f32 1e-05, %v666_v3  ;;  %v667_v11 = vsub.f32 %v635_v4, %v651_v1  ;;  %v2295_v12 = vmul.f32 0.015625, %v525_v5 }
 0x19c   :  { %v528_v63 = vpop.xlane.xlu1 %527  ;;  %v766_v2 = vadd.f32 %v2278_v50, %v746_v6  ;;  %v747_v13 = vmul.f32 %v2267_v30, %v727_v8 }
 0x19d   :  { %1826 = vrsqrt.f32 %v698_v9  ;;  %v699_v14 = vadd.f32 1e-05, %v667_v11  ;;  %v2301_v19 = vmul.f32 0.015625, %v528_v63  ;;  %v652_v25 = vmul.f32 %v2295_v12, %v2295_v12 }
 0x19e   :  { %1751 = vmatprep.mubr.msk.f32.mxu1 %vm498_vm3, %v766_v2  ;;  %v606_v20 = vpop.xlane.xlu0 %605  ;;  %v767_v21 = vadd.f32 %v2278_v50, %v747_v13  ;;  %v684_v11 = vsub.f32 %v2160_v44, %v2295_v12 }
 0x19f   :  { %v1823_v24 = vpop.eup %1822  ;;  %1828 = vrsqrt.f32 %v699_v14  ;;  %v636_v26 = vmul.f32 0.015625, %v606_v20  ;;  %v653_v32 = vmul.f32 %v2301_v19, %v2301_v19 }
 0x1a0   :  { %1752 = vmatmul.mubr.msk.f32.gmra.mrb[10].mxu1 %vm498_vm3, %v767_v21  ;;  %v609_v31 = vpop.xlane.xlu1 %608  ;;  %v728_v10 = vmul.f32 %v1823_v24, %v680_v17  ;;  %v685_v21 = vsub.f32 %v2173_v53, %v2301_v19 }
 0x1a1   :  { %v1825_v16 = vpop.eup %1824  ;;  %v668_v49 = vsub.f32 %v636_v26, %v652_v25  ;;  %v637_v35 = vmul.f32 0.015625, %v609_v31 }
 0x1a2   :  { %v531_v36 = vpop.xlane.xlu0 %530  ;;  %v748_v41 = vmul.f32 %v2267_v30, %v728_v10  ;;  %v729_v37 = vmul.f32 %v1825_v16, %v681_v27 }
 0x1a3   :  { %v700_v38 = vadd.f32 1e-05, %v668_v49  ;;  %v669_v39 = vsub.f32 %v637_v35, %v653_v32  ;;  %v2313_v40 = vmul.f32 0.015625, %v531_v36 }
 0x1a4   :  { %v534_v42 = vpop.xlane.xlu1 %533  ;;  %v768_v15 = vadd.f32 %v2278_v50, %v748_v41  ;;  %v749_v23 = vmul.f32 %v2267_v30, %v729_v37 }
 0x1a5   :  { %1830 = vrsqrt.f32 %v700_v38  ;;  %v701_v45 = vadd.f32 1e-05, %v669_v39  ;;  %v2319_v51 = vmul.f32 0.015625, %v534_v42  ;;  %v654_v55 = vmul.f32 %v2313_v40, %v2313_v40 }
 0x1a6   :  { %1754 = vmatprep.mubr.msk.f32.mxu1 %vm498_vm3, %v768_v15  ;;  %v612_v46 = vpop.xlane.xlu0 %611  ;;  %v769_v52 = vadd.f32 %v2278_v50, %v749_v23  ;;  %v686_v37 = vsub.f32 %v2188_v0, %v2313_v40 }
 0x1a7   :  { %v1827_v54 = vpop.eup %1826  ;;  %1832 = vrsqrt.f32 %v701_v45  ;;  %v638_v56 = vmul.f32 0.015625, %v612_v46  ;;  %v655_v59 = vmul.f32 %v2319_v51, %v2319_v51 }
 0x1a8   :  { %1755 = vmatmul.mubr.msk.f32.gmra.mrb[12].mxu1 %vm498_vm3, %v769_v52  ;;  %v615_v58 = vpop.xlane.xlu1 %614  ;;  %v730_v28 = vmul.f32 %v1827_v54, %v682_v47  ;;  %v687_v47 = vsub.f32 %v2201_v7, %v2319_v51 }
 0x1a9   :  { %v1829_v43 = vpop.eup %1828  ;;  %v670_v62 = vsub.f32 %v638_v56, %v654_v55  ;;  %v639_v60 = vmul.f32 0.015625, %v615_v58 }
 0x1aa   :  { %v537_v61 = vpop.xlane.xlu0 %536  ;;  %v750_v1 = vmul.f32 %v2267_v30, %v730_v28  ;;  %v731_v3 = vmul.f32 %v1829_v43, %v683_v57 }
 0x1ab   :  { %v702_v4 = vadd.f32 1e-05, %v670_v62  ;;  %v671_v5 = vsub.f32 %v639_v60, %v655_v59  ;;  %v2331_v6 = vmul.f32 0.015625, %v537_v61 }
 0x1ac   :  { %v540_v8 = vpop.xlane.xlu1 %539  ;;  %v770_v33 = vadd.f32 %v2278_v50, %v750_v1  ;;  %v751_v48 = vmul.f32 %v2267_v30, %v731_v3 }
 0x1ad   :  { %1834 = vrsqrt.f32 %v702_v4  ;;  %v703_v9 = vadd.f32 1e-05, %v671_v5  ;;  %v2337_v63 = vmul.f32 0.015625, %v540_v8  ;;  %v656_v17 = vmul.f32 %v2331_v6, %v2331_v6 }
 0x1ae   :  { %1757 = vmatprep.mubr.msk.f32.mxu1 %vm498_vm3, %v770_v33  ;;  %v618_v2 = vpop.xlane.xlu0 %617  ;;  %v771_v13 = vadd.f32 %v2278_v50, %v751_v48  ;;  %v688_v7 = vsub.f32 %v2216_v18, %v2331_v6 }
 0x1af   :  { %v1831_v14 = vpop.eup %1830  ;;  %1836 = vrsqrt.f32 %v703_v9  ;;  %v640_v20 = vmul.f32 0.015625, %v618_v2  ;;  %v657_v25 = vmul.f32 %v2337_v63, %v2337_v63  ;;  %v689_v61 = vsub.f32 %v2223_v22, %v2337_v63 }
 0x1b0   :  { %1758 = vmatmul.mubr.msk.f32.gmra.mrb[14].mxu1 %vm498_vm3, %v771_v13  ;;  %v621_v24 = vpop.xlane.xlu1 %620  ;;  %v732_v44 = vmul.f32 %v1831_v14, %v684_v11 }
 0x1b1   :  { %v1833_v12 = vpop.eup %1832  ;;  %v672_v26 = vsub.f32 %v640_v20, %v656_v17  ;;  %v641_v27 = vmul.f32 0.015625, %v621_v24 }
 0x1b2   :  { %v543_v31 = vpop.xlane.xlu0 %542  ;;  %v752_v10 = vmul.f32 %v2267_v30, %v732_v44  ;;  %v733_v16 = vmul.f32 %v1833_v12, %v685_v21 }
 0x1b3   :  { %v704_v32 = vadd.f32 1e-05, %v672_v26  ;;  %v673_v49 = vsub.f32 %v641_v27, %v657_v25  ;;  %v562_v35 = vmul.f32 0.015625, %v543_v31 }
 0x1b4   :  { %v546_v36 = vpop.xlane.xlu1 %545  ;;  %v772_v53 = vadd.f32 %v2278_v50, %v752_v10  ;;  %v753_v19 = vmul.f32 %v2267_v30, %v733_v16 }
 0x1b5   :  { %1838 = vrsqrt.f32 %v704_v32  ;;  %v705_v41 = vadd.f32 1e-05, %v673_v49  ;;  %v563_v38 = vmul.f32 0.015625, %v546_v36  ;;  %v658_v23 = vmul.f32 %v562_v35, %v562_v35 }
 0x1b6   :  { %1760 = vmatprep.mubr.msk.f32.mxu1 %vm498_vm3, %v772_v53  ;;  %v624_v39 = vpop.xlane.xlu0 %623  ;;  %v773_v42 = vadd.f32 %v2278_v50, %v753_v19  ;;  %v690_v6 = vsub.f32 %v2233_v29, %v562_v35 }
 0x1b7   :  { %v1835_v15 = vpop.eup %1834  ;;  %1840 = vrsqrt.f32 %v705_v41  ;;  %v642_v45 = vmul.f32 0.015625, %v624_v39  ;;  %v659_v55 = vmul.f32 %v563_v38, %v563_v38  ;;  %v691_v22 = vsub.f32 %v2240_v34, %v563_v38  ;;  %v2385_v34 = vld [vmem:[%s2727_s6] ss:$0 sm:$0xff] }
 0x1b8   :  { %v627_v46 = vpop.xlane.xlu1 %626  ;;  %1761 = vmatmul.mubr.msk.f32.gmra.mrb[16].mxu1 %vm498_vm3, %v773_v42  ;;  %v734_v52 = vmul.f32 %v1835_v15, %v686_v37 }
 0x1b9   :  { %v1837_v54 = vpop.eup %1836  ;;  %v674_v0 = vsub.f32 %v642_v45, %v658_v23  ;;  %v643_v40 = vmul.f32 0.015625, %v627_v46 }
 0x1ba   :  { %v754_v56 = vmul.f32 %v2267_v30, %v734_v52  ;;  %v735_v57 = vmul.f32 %v1837_v54, %v687_v47 }
 0x1bb   :  { %v706_v58 = vadd.f32 1e-05, %v674_v0  ;;  %v675_v28 = vsub.f32 %v643_v40, %v659_v55 }
 0x1bc   :  { %v774_v43 = vadd.f32 %v2278_v50, %v754_v56  ;;  %v755_v59 = vmul.f32 %v2267_v30, %v735_v57 }
 0x1bd   :  { %1842 = vrsqrt.f32 %v706_v58  ;;  %v707_v62 = vadd.f32 1e-05, %v675_v28 }
 0x1be   :  { %1763 = vmatprep.mubr.msk.f32.mxu1 %vm498_vm3, %v774_v43  ;;  %v775_v51 = vadd.f32 %v2278_v50, %v755_v59 }
 0x1bf   :  { %v1839_v60 = vpop.eup %1838  ;;  %1844 = vrsqrt.f32 %v707_v62 }
 0x1c0   :  { %1764 = vmatmul.mubr.msk.f32.gmra.mrb[18].mxu1 %vm498_vm3, %v775_v51  ;;  %v736_v1 = vmul.f32 %v1839_v60, %v688_v7 }
 0x1c1   :  { %v1841_v3 = vpop.eup %1840 }
 0x1c2   :  { %v756_v4 = vmul.f32 %v2267_v30, %v736_v1  ;;  %v737_v5 = vmul.f32 %v1841_v3, %v689_v61 }
 0x1c4   :  { %v776_v8 = vadd.f32 %v2278_v50, %v756_v4  ;;  %v757_v18 = vmul.f32 %v2267_v30, %v737_v5 }
 0x1c6   :  { %1766 = vmatprep.mubr.msk.f32.mxu1 %vm498_vm3, %v776_v8  ;;  %v777_v33 = vadd.f32 %v2278_v50, %v757_v18 }
 0x1c7   :  { %v1843_v48 = vpop.eup %1842 }
 0x1c8   :  { %1767 = vmatmul.mubr.msk.f32.gmra.mrb[20].mxu1 %vm498_vm3, %v777_v33  ;;  %v738_v9 = vmul.f32 %v1843_v48, %v690_v6 }
 0x1c9   :  { %v1845_v11 = vpop.eup %1844 }
 0x1ca   :  { %v758_v63 = vmul.f32 %v2267_v30, %v738_v9  ;;  %v739_v2 = vmul.f32 %v1845_v11, %v691_v22 }
 0x1cc   :  { %v778_v13 = vadd.f32 %v2278_v50, %v758_v63  ;;  %v759_v14 = vmul.f32 %v2267_v30, %v739_v2 }
 0x1ce   :  { %1769 = vmatprep.mubr.msk.f32.mxu1 %vm498_vm3, %v778_v13  ;;  %v779_v29 = vadd.f32 %v2278_v50, %v759_v14 }
 0x1d0   :  { %1770 = vmatmul.mubr.msk.f32.gmra.mrb[22].mxu1 %vm498_vm3, %v779_v29  ;;  %vm1544_vm3 = vcmask 1048512  }
 0x26c   :  { %v1750_v17 = vpop.f32.mrb[8].mxu1 }
 0x26d   :  { %v912_v20 = vadd.f32 %v1750_v17, %v2385_v34  ;;  %v906_v21 = vpop.f32.mrb[9].mxu1 }
 0x26e   :  { %v907_v24 = vadd.f32 %v2385_v34, %v906_v21 }
 0x26f   :  { %v2389_v44 = vmax.f32 %v912_v20, 0.0 }
 0x270   :  { %v2391_v30 = vmax.f32 %v907_v24, 0.0 }
 0x271   :  { %v1005_v50 = vsel %vm1001_vm4, %v2389_v44, 0.0  ;;  %v1068_v12 = vmul.f32 %v2389_v44, %v2389_v44 }
 0x272   :  { %1006 = vadd.xlane.f32.xlu1 %v1005_v50  ;;  %v1002_v25 = vsel %vm1001_vm4, %v2391_v30, 0.0  ;;  %v1067_v26 = vmul.f32 %v2391_v30, %v2391_v30 }
 0x273   :  { %v1753_v27 = vpop.f32.mrb[10].mxu1  ;;  %1003 = vadd.xlane.f32.xlu0 %v1002_v25  ;;  %v1086_v32 = vsel %vm1001_vm4, %v1068_v12, 0.0 }
 0x274   :  { %v922_v31 = vadd.f32 %v1753_v27, %v2385_v34  ;;  %v916_v10 = vpop.f32.mrb[11].mxu1  ;;  %v1083_v35 = vsel %vm1001_vm4, %v1067_v26, 0.0 }
 0x275   :  { %v917_v16 = vadd.f32 %v2385_v34, %v916_v10 }
 0x276   :  { %v2404_v49 = vmax.f32 %v922_v31, 0.0  ;;  %1087 = vadd.xlane.f32.xlu1 %v1086_v32 }
 0x277   :  { %v2407_v36 = vmax.f32 %v917_v16, 0.0  ;;  %1084 = vadd.xlane.f32.xlu0 %v1083_v35 }
 0x278   :  { %v1011_v53 = vsel %vm1001_vm4, %v2404_v49, 0.0  ;;  %v1070_v41 = vmul.f32 %v2404_v49, %v2404_v49 }
 0x279   :  { %v1008_v19 = vsel %vm1001_vm4, %v2407_v36, 0.0  ;;  %v1069_v23 = vmul.f32 %v2407_v36, %v2407_v36 }
 0x27a   :  { %1012 = vadd.xlane.f32.xlu1 %v1011_v53  ;;  %v1092_v15 = vsel %vm1001_vm4, %v1070_v41, 0.0 }
 0x27b   :  { %v1756_v37 = vpop.f32.mrb[12].mxu1  ;;  %1009 = vadd.xlane.f32.xlu0 %v1008_v19  ;;  %v1089_v52 = vsel %vm1001_vm4, %v1069_v23, 0.0 }
 0x27c   :  { %v932_v38 = vadd.f32 %v1756_v37, %v2385_v34  ;;  %v926_v39 = vpop.f32.mrb[13].mxu1 }
 0x27d   :  { %v927_v42 = vadd.f32 %v2385_v34, %v926_v39 }
 0x27e   :  { %v2420_v45 = vmax.f32 %v932_v38, 0.0  ;;  %1093 = vadd.xlane.f32.xlu1 %v1092_v15 }
 0x27f   :  { %v2422_v47 = vmax.f32 %v927_v42, 0.0 }
 0x280   :  { %v1017_v46 = vsel %vm1001_vm4, %v2420_v45, 0.0  ;;  %v1072_v54 = vmul.f32 %v2420_v45, %v2420_v45 }
 0x281   :  { %1018 = vadd.xlane.f32.xlu0 %v1017_v46  ;;  %v1014_v56 = vsel %vm1001_vm4, %v2422_v47, 0.0  ;;  %v1071_v28 = vmul.f32 %v2422_v47, %v2422_v47 }
 0x282   :  { %1090 = vadd.xlane.f32.xlu1 %v1089_v52  ;;  %v1098_v58 = vsel %vm1001_vm4, %v1072_v54, 0.0 }
 0x283   :  { %v1759_v55 = vpop.f32.mrb[14].mxu1  ;;  %v1095_v7 = vsel %vm1001_vm4, %v1071_v28, 0.0 }
 0x284   :  { %v942_v0 = vadd.f32 %v1759_v55, %v2385_v34  ;;  %v936_v40 = vpop.f32.mrb[15].mxu1 }
 0x285   :  { %v937_v57 = vadd.f32 %v2385_v34, %v936_v40  ;;  %1015 = vadd.xlane.f32.xlu0 %v1014_v56 }
 0x286   :  { %v2436_v43 = vmax.f32 %v942_v0, 0.0  ;;  %1099 = vadd.xlane.f32.xlu1 %v1098_v58 }
 0x287   :  { %v2438_v59 = vmax.f32 %v937_v57, 0.0 }
 0x288   :  { %v1023_v62 = vsel %vm1001_vm4, %v2436_v43, 0.0  ;;  %v1074_v51 = vmul.f32 %v2436_v43, %v2436_v43 }
 0x289   :  { %1024 = vadd.xlane.f32.xlu0 %v1023_v62  ;;  %v1020_v3 = vsel %vm1001_vm4, %v2438_v59, 0.0  ;;  %v1073_v8 = vmul.f32 %v2438_v59, %v2438_v59 }
 0x28a   :  { %1096 = vadd.xlane.f32.xlu1 %v1095_v7  ;;  %v1104_v5 = vsel %vm1001_vm4, %v1074_v51, 0.0 }
 0x28b   :  { %v1762_v60 = vpop.f32.mrb[16].mxu1  ;;  %v1101_v48 = vsel %vm1001_vm4, %v1073_v8, 0.0 }
 0x28c   :  { %v952_v61 = vadd.f32 %v1762_v60, %v2385_v34  ;;  %v946_v1 = vpop.f32.mrb[17].mxu1 }
 0x28d   :  { %v947_v4 = vadd.f32 %v2385_v34, %v946_v1  ;;  %1021 = vadd.xlane.f32.xlu0 %v1020_v3 }
 0x28e   :  { %v2452_v18 = vmax.f32 %v952_v61, 0.0  ;;  %1105 = vadd.xlane.f32.xlu1 %v1104_v5 }
 0x28f   :  { %v2454_v6 = vmax.f32 %v947_v4, 0.0 }
 0x290   :  { %v1029_v33 = vsel %vm1001_vm4, %v2452_v18, 0.0  ;;  %v1076_v22 = vmul.f32 %v2452_v18, %v2452_v18 }
 0x291   :  { %1030 = vadd.xlane.f32.xlu0 %v1029_v33  ;;  %v1026_v2 = vsel %vm1001_vm4, %v2454_v6, 0.0  ;;  %v1075_v29 = vmul.f32 %v2454_v6, %v2454_v6 }
 0x292   :  { %1102 = vadd.xlane.f32.xlu1 %v1101_v48  ;;  %v1110_v14 = vsel %vm1001_vm4, %v1076_v22, 0.0 }
 0x293   :  { %v1765_v9 = vpop.f32.mrb[18].mxu1  ;;  %v1107_v24 = vsel %vm1001_vm4, %v1075_v29, 0.0 }
 0x294   :  { %v962_v11 = vadd.f32 %v1765_v9, %v2385_v34  ;;  %v956_v63 = vpop.f32.mrb[19].mxu1 }
 0x295   :  { %v957_v13 = vadd.f32 %v2385_v34, %v956_v63  ;;  %1027 = vadd.xlane.f32.xlu0 %v1026_v2 }
 0x296   :  { %v2468_v17 = vmax.f32 %v962_v11, 0.0  ;;  %1111 = vadd.xlane.f32.xlu1 %v1110_v14 }
 0x297   :  { %v2470_v20 = vmax.f32 %v957_v13, 0.0 }
 0x298   :  { %v1035_v21 = vsel %vm1001_vm4, %v2468_v17, 0.0  ;;  %v1078_v50 = vmul.f32 %v2468_v17, %v2468_v17 }
 0x299   :  { %1036 = vadd.xlane.f32.xlu0 %v1035_v21  ;;  %v1032_v27 = vsel %vm1001_vm4, %v2470_v20, 0.0  ;;  %v1077_v16 = vmul.f32 %v2470_v20, %v2470_v20 }
 0x29a   :  { %1108 = vadd.xlane.f32.xlu1 %v1107_v24  ;;  %v1116_v10 = vsel %vm1001_vm4, %v1078_v50, 0.0 }
 0x29b   :  { %v1768_v12 = vpop.f32.mrb[20].mxu1  ;;  %v1113_v19 = vsel %vm1001_vm4, %v1077_v16, 0.0 }
 0x29c   :  { %v972_v25 = vadd.f32 %v1768_v12, %v2385_v34  ;;  %v966_v26 = vpop.f32.mrb[21].mxu1 }
 0x29d   :  { %v967_v31 = vadd.f32 %v2385_v34, %v966_v26  ;;  %1033 = vadd.xlane.f32.xlu0 %v1032_v27 }
 0x29e   :  { %v2484_v32 = vmax.f32 %v972_v25, 0.0  ;;  %1117 = vadd.xlane.f32.xlu1 %v1116_v10 }
 0x29f   :  { %v2486_v35 = vmax.f32 %v967_v31, 0.0 }
 0x2a0   :  { %v1041_v53 = vsel %vm1001_vm4, %v2484_v32, 0.0  ;;  %v1080_v41 = vmul.f32 %v2484_v32, %v2484_v32 }
 0x2a1   :  { %1042 = vadd.xlane.f32.xlu0 %v1041_v53  ;;  %v1038_v42 = vsel %vm1001_vm4, %v2486_v35, 0.0  ;;  %v1079_v46 = vmul.f32 %v2486_v35, %v2486_v35 }
 0x2a2   :  { %1114 = vadd.xlane.f32.xlu1 %v1113_v19  ;;  %v1122_v23 = vsel %vm1001_vm4, %v1080_v41, 0.0 }
 0x2a3   :  { %v1771_v37 = vpop.f32.mrb[22].mxu1  ;;  %v1119_v0 = vsel %vm1001_vm4, %v1079_v46, 0.0 }
 0x2a4   :  { %v982_v38 = vadd.f32 %v1771_v37, %v2385_v34  ;;  %v976_v39 = vpop.f32.mrb[23].mxu1 }
 0x2a5   :  { %v977_v15 = vadd.f32 %v2385_v34, %v976_v39  ;;  %1039 = vadd.xlane.f32.xlu0 %v1038_v42 }
 0x2a6   :  { %v2500_v52 = vmax.f32 %v982_v38, 0.0  ;;  %1123 = vadd.xlane.f32.xlu1 %v1122_v23 }
 0x2a7   :  { %v2502_v54 = vmax.f32 %v977_v15, 0.0  ;;  %v2530_v15 = vld [vmem:[%s2727_s6 + $0x1] ss:$0 sm:$0xff] }
 0x2a8   :  { %v1047_v55 = vsel %vm1001_vm4, %v2500_v52, 0.0  ;;  %v1082_v34 = vmul.f32 %v2500_v52, %v2500_v52 }
 0x2a9   :  { %1048 = vadd.xlane.f32.xlu0 %v1047_v55  ;;  %v1044_v40 = vsel %vm1001_vm4, %v2502_v54, 0.0  ;;  %v1081_v56 = vmul.f32 %v2502_v54, %v2502_v54 }
 0x2aa   :  { %1120 = vadd.xlane.f32.xlu1 %v1119_v0  ;;  %v1128_v57 = vsel %vm1001_vm4, %v1082_v34, 0.0 }
 0x2ab   :  { %v1125_v58 = vsel %vm1001_vm4, %v1081_v56, 0.0 }
 0x2ad   :  { %1045 = vadd.xlane.f32.xlu0 %v1044_v40 }
 0x2ae   :  { %1129 = vadd.xlane.f32.xlu1 %v1128_v57 }
 0x2b1   :  { %1126 = vadd.xlane.f32.xlu0 %v1125_v58 }
 0x2ff   :  { %v1007_v28 = vpop.xlane.xlu1 %1006 }
 0x300   :  { %v1052_v62 = vmul.f32 0.03125, %v1007_v28  ;;  %v1004_v7 = vpop.xlane.xlu0 %1003 }
 0x301   :  { %v1051_v51 = vmul.f32 0.03125, %v1004_v7 }
 0x302   :  { %v1148_v61 = vmul.f32 %v1052_v62, %v1052_v62  ;;  %v1180_v16 = vsub.f32 %v2389_v44, %v1052_v62  ;;  %v2545_v62 = vld [vmem:[%s2727_s6 + $0x3] ss:$0 sm:$0xff] }
 0x303   :  { %v1088_v60 = vpop.xlane.xlu1 %1087  ;;  %v1147_v4 = vmul.f32 %v1051_v51, %v1051_v51  ;;  %v1179_v53 = vsub.f32 %v2391_v30, %v1051_v51  ;;  %v2535_v30 = vld [vmem:[%s2727_s6 + $0x2] ss:$0 sm:$0xff] }
 0x304   :  { %v1132_v1 = vmul.f32 0.03125, %v1088_v60  ;;  %v1085_v3 = vpop.xlane.xlu0 %1084 }
 0x305   :  { %v1131_v5 = vmul.f32 0.03125, %v1085_v3 }
 0x306   :  { %v1164_v8 = vsub.f32 %v1132_v1, %v1148_v61 }
 0x307   :  { %v1163_v33 = vsub.f32 %v1131_v5, %v1147_v4  ;;  %v1013_v48 = vpop.xlane.xlu1 %1012 }
 0x308   :  { %v1196_v22 = vadd.f32 1e-05, %v1164_v8  ;;  %v1054_v9 = vmul.f32 0.03125, %v1013_v48  ;;  %v1010_v63 = vpop.xlane.xlu0 %1009 }
 0x309   :  { %v1195_v11 = vadd.f32 1e-05, %v1163_v33  ;;  %v2515_v14 = vmul.f32 0.03125, %v1010_v63 }
 0x30a   :  { %1846 = vrsqrt.f32 %v1196_v22  ;;  %v1150_v13 = vmul.f32 %v1054_v9, %v1054_v9  ;;  %v1182_v3 = vsub.f32 %v2404_v49, %v1054_v9 }
 0x30b   :  { %1848 = vrsqrt.f32 %v1195_v11  ;;  %v1094_v2 = vpop.xlane.xlu1 %1093  ;;  %v1149_v12 = vmul.f32 %v2515_v14, %v2515_v14 }
 0x30c   :  { %v1134_v29 = vmul.f32 0.03125, %v1094_v2 }
 0x30e   :  { %v1166_v21 = vsub.f32 %v1134_v29, %v1150_v13  ;;  %v1019_v24 = vpop.xlane.xlu0 %1018 }
 0x30f   :  { %v1091_v50 = vpop.xlane.xlu1 %1090  ;;  %v2519_v26 = vmul.f32 0.03125, %v1019_v24 }
 0x310   :  { %v1198_v25 = vadd.f32 1e-05, %v1166_v21  ;;  %v1133_v27 = vmul.f32 0.03125, %v1091_v50  ;;  %v1181_v21 = vsub.f32 %v2407_v36, %v2515_v14 }
 0x311   :  { %v1152_v37 = vmul.f32 %v2519_v26, %v2519_v26  ;;  %v1184_v36 = vsub.f32 %v2420_v45, %v2519_v26 }
 0x312   :  { %1850 = vrsqrt.f32 %v1198_v25  ;;  %v1165_v31 = vsub.f32 %v1133_v27, %v1149_v12  ;;  %v1016_v10 = vpop.xlane.xlu0 %1015 }
 0x313   :  { %v1100_v19 = vpop.xlane.xlu1 %1099  ;;  %v2525_v39 = vmul.f32 0.03125, %v1016_v10 }
 0x314   :  { %v1847_v41 = vpop.eup %1846  ;;  %v1197_v38 = vadd.f32 1e-05, %v1165_v31  ;;  %v1136_v42 = vmul.f32 0.03125, %v1100_v19 }
 0x315   :  { %v1849_v23 = vpop.eup %1848  ;;  %v1228_v46 = vmul.f32 %v1847_v41, %v1180_v16  ;;  %v1151_v57 = vmul.f32 %v2525_v39, %v2525_v39 }
 0x316   :  { %1852 = vrsqrt.f32 %v1197_v38  ;;  %v1168_v44 = vsub.f32 %v1136_v42, %v1152_v37  ;;  %v1025_v55 = vpop.xlane.xlu0 %1024  ;;  %v1227_v0 = vmul.f32 %v1849_v23, %v1179_v53 }
 0x317   :  { %v2537_v34 = vmul.f32 0.03125, %v1025_v55  ;;  %v1097_v40 = vpop.xlane.xlu1 %1096  ;;  %v1248_v56 = vmul.f32 %v2530_v15, %v1228_v46 }
 0x318   :  { %v1200_v58 = vadd.f32 1e-05, %v1168_v44  ;;  %v1135_v28 = vmul.f32 0.03125, %v1097_v40  ;;  %v1247_v7 = vmul.f32 %v2530_v15, %v1227_v0 }
 0x319   :  { %v1268_v51 = vadd.f32 %v2535_v30, %v1248_v56  ;;  %v1154_v4 = vmul.f32 %v2537_v34, %v2537_v34 }
 0x31a   :  { %1854 = vrsqrt.f32 %v1200_v58  ;;  %v1167_v60 = vsub.f32 %v1135_v28, %v1151_v57  ;;  %v1022_v61 = vpop.xlane.xlu0 %1021  ;;  %v1267_v1 = vadd.f32 %v2535_v30, %v1247_v7  ;;  %v1183_v57 = vsub.f32 %v2422_v47, %v2525_v39 }
 0x31b   :  { %v1106_v5 = vpop.xlane.xlu1 %1105  ;;  %v1288_v8 = vmul.f32 %v2545_v62, %v1268_v51  ;;  %v2554_v22 = vmul.f32 0.03125, %v1022_v61 }
 0x31c   :  { %v1851_v33 = vpop.eup %1850  ;;  %v1199_v48 = vadd.f32 1e-05, %v1167_v60  ;;  %v1138_v11 = vmul.f32 0.03125, %v1106_v5  ;;  %v1287_v63 = vmul.f32 %v2545_v62, %v1267_v1 }
 0x31d   :  { %v1306_v2 = vsel %vm1001_vm4, %v1288_v8, 0.0  ;;  %v1230_v13 = vmul.f32 %v1851_v33, %v1182_v3  ;;  %v1153_v25 = vmul.f32 %v2554_v22, %v2554_v22  ;;  %v1186_v33 = vsub.f32 %v2436_v43, %v2537_v34 }
 0x31e   :  { %1856 = vrsqrt.f32 %v1199_v48  ;;  %v1170_v29 = vsub.f32 %v1138_v11, %v1154_v4  ;;  %1307 = vadd.xlane.f32.xlu1 %v1306_v2  ;;  %v1031_v49 = vpop.xlane.xlu0 %1030  ;;  %v1303_v9 = vsel %vm1001_vm4, %v1287_v63, 0.0 }
 0x31f   :  { %v1103_v24 = vpop.xlane.xlu1 %1102  ;;  %1304 = vadd.xlane.f32.xlu0 %v1303_v9  ;;  %v1250_v50 = vmul.f32 %v2530_v15, %v1230_v13  ;;  %v2564_v31 = vmul.f32 0.03125, %v1031_v49 }
 0x320   :  { %v1853_v12 = vpop.eup %1852  ;;  %v1202_v27 = vadd.f32 1e-05, %v1170_v29  ;;  %v1137_v10 = vmul.f32 0.03125, %v1103_v24 }
 0x321   :  { %v1270_v16 = vadd.f32 %v2535_v30, %v1250_v50  ;;  %v1229_v53 = vmul.f32 %v1853_v12, %v1181_v21  ;;  %v1156_v23 = vmul.f32 %v2564_v31, %v2564_v31  ;;  %v1185_v12 = vsub.f32 %v2438_v59, %v2554_v22 }
 0x322   :  { %1858 = vrsqrt.f32 %v1202_v27  ;;  %v1169_v19 = vsub.f32 %v1137_v10, %v1153_v25  ;;  %v1028_v41 = vpop.xlane.xlu0 %1027 }
 0x323   :  { %v1112_v14 = vpop.xlane.xlu1 %1111  ;;  %v1290_v37 = vmul.f32 %v2545_v62, %v1270_v16  ;;  %v1249_v38 = vmul.f32 %v2530_v15, %v1229_v53  ;;  %v2573_v44 = vmul.f32 0.03125, %v1028_v41  ;;  %v1902_v16 = vmov 0  }
 0x324   :  { %v1855_v42 = vpop.eup %1854  ;;  %v1201_v46 = vadd.f32 1e-05, %v1169_v19  ;;  %v1140_v55 = vmul.f32 0.03125, %v1112_v14  ;;  %1813 = vset.pattern.permute.xlu0 %v1902_v16  ;;  %1812 = vset.pattern.permute.xlu1 %v1902_v16 }
 0x325   :  { %v1312_v0 = vsel %vm1001_vm4, %v1290_v37, 0.0  ;;  %v1269_v40 = vadd.f32 %v2535_v30, %v1249_v38  ;;  %v1232_v26 = vmul.f32 %v1855_v42, %v1184_v36  ;;  %v1155_v60 = vmul.f32 %v2573_v44, %v2573_v44 }
 0x326   :  { %1860 = vrsqrt.f32 %v1201_v46  ;;  %v1172_v56 = vsub.f32 %v1140_v55, %v1156_v23  ;;  %1313 = vadd.xlane.f32.xlu1 %v1312_v0  ;;  %v1037_v45 = vpop.xlane.xlu0 %1036  ;;  %v1188_v23 = vsub.f32 %v2452_v18, %v2564_v31 }
 0x327   :  { %v2579_v58 = vmul.f32 0.03125, %v1037_v45  ;;  %v1109_v28 = vpop.xlane.xlu1 %1108  ;;  %v1289_v7 = vmul.f32 %v2545_v62, %v1269_v40  ;;  %v1252_v3 = vmul.f32 %v2530_v15, %v1232_v26 }
 0x328   :  { %v1857_v51 = vpop.eup %1856  ;;  %v1204_v61 = vadd.f32 1e-05, %v1172_v56  ;;  %v1139_v1 = vmul.f32 0.03125, %v1109_v28 }
 0x329   :  { %v1309_v4 = vsel %vm1001_vm4, %v1289_v7, 0.0  ;;  %v1231_v5 = vmul.f32 %v1857_v51, %v1183_v57  ;;  %v1272_v39 = vadd.f32 %v2535_v30, %v1252_v3  ;;  %v1158_v48 = vmul.f32 %v2579_v58, %v2579_v58 }
 0x32a   :  { %1862 = vrsqrt.f32 %v1204_v61  ;;  %v1171_v8 = vsub.f32 %v1139_v1, %v1155_v60  ;;  %1310 = vadd.xlane.f32.xlu0 %v1309_v4  ;;  %v1034_v47 = vpop.xlane.xlu0 %1033  ;;  %v1187_v60 = vsub.f32 %v2454_v6, %v2573_v44 }
 0x32b   :  { %v1118_v11 = vpop.xlane.xlu1 %1117  ;;  %v1251_v63 = vmul.f32 %v2530_v15, %v1231_v5  ;;  %v2592_v29 = vmul.f32 0.03125, %v1034_v47  ;;  %v1292_v9 = vmul.f32 %v2545_v62, %v1272_v39 }
 0x32c   :  { %v1859_v2 = vpop.eup %1858  ;;  %v1203_v13 = vadd.f32 1e-05, %v1171_v8  ;;  %v1142_v49 = vmul.f32 0.03125, %v1118_v11 }
 0x32d   :  { %v1271_v21 = vadd.f32 %v2535_v30, %v1251_v63  ;;  %v1234_v24 = vmul.f32 %v1859_v2, %v1186_v33  ;;  %v1318_v43 = vsel %vm1001_vm4, %v1292_v9, 0.0  ;;  %v1157_v19 = vmul.f32 %v2592_v29, %v2592_v29 }
 0x32e   :  { %1864 = vrsqrt.f32 %v1203_v13  ;;  %v1174_v50 = vsub.f32 %v1142_v49, %v1158_v48  ;;  %v1043_v34 = vpop.xlane.xlu0 %1042  ;;  %1319 = vadd.xlane.f32.xlu1 %v1318_v43  ;;  %v1189_v16 = vsub.f32 %v2470_v20, %v2592_v29 }
 0x32f   :  { %v1115_v25 = vpop.xlane.xlu1 %1114  ;;  %v1291_v27 = vmul.f32 %v2545_v62, %v1271_v21  ;;  %v1254_v10 = vmul.f32 %v2530_v15, %v1234_v24  ;;  %v2603_v36 = vmul.f32 0.03125, %v1043_v34  ;;  %v1190_v21 = vsub.f32 %v2468_v17, %v2579_v58 }
 0x330   :  { %v1861_v53 = vpop.eup %1860  ;;  %v1206_v41 = vadd.f32 1e-05, %v1174_v50  ;;  %v1141_v14 = vmul.f32 0.03125, %v1115_v25 }
 0x331   :  { %v1315_v37 = vsel %vm1001_vm4, %v1291_v27, 0.0  ;;  %v1274_v59 = vadd.f32 %v2535_v30, %v1254_v10  ;;  %v1233_v42 = vmul.f32 %v1861_v53, %v1185_v12  ;;  %v1160_v56 = vmul.f32 %v2603_v36, %v2603_v36 }
 0x332   :  { %1866 = vrsqrt.f32 %v1206_v41  ;;  %v1173_v22 = vsub.f32 %v1141_v14, %v1157_v19  ;;  %1316 = vadd.xlane.f32.xlu0 %v1315_v37  ;;  %v1040_v38 = vpop.xlane.xlu0 %1039 }
 0x333   :  { %v2609_v46 = vmul.f32 0.03125, %v1040_v38  ;;  %v1124_v55 = vpop.xlane.xlu1 %1123  ;;  %v1294_v0 = vmul.f32 %v2545_v62, %v1274_v59  ;;  %v1253_v57 = vmul.f32 %v2530_v15, %v1233_v42  ;;  %v1192_v42 = vsub.f32 %v2484_v32, %v2603_v36 }
 0x334   :  { %v1863_v40 = vpop.eup %1862  ;;  %v1205_v45 = vadd.f32 1e-05, %v1173_v22  ;;  %v1144_v26 = vmul.f32 0.03125, %v1124_v55 }
 0x335   :  { %v1324_v28 = vsel %vm1001_vm4, %v1294_v0, 0.0  ;;  %v1236_v7 = vmul.f32 %v1863_v40, %v1188_v23  ;;  %v1273_v31 = vadd.f32 %v2535_v30, %v1253_v57  ;;  %v1159_v61 = vmul.f32 %v2609_v46, %v2609_v46 }
 0x336   :  { %1868 = vrsqrt.f32 %v1205_v45  ;;  %v1176_v51 = vsub.f32 %v1144_v26, %v1160_v56  ;;  %1325 = vadd.xlane.f32.xlu1 %v1324_v28  ;;  %v1049_v18 = vpop.xlane.xlu0 %1048  ;;  %v1191_v45 = vsub.f32 %v2486_v35, %v2609_v46 }
 0x337   :  { %v1121_v1 = vpop.xlane.xlu1 %1120  ;;  %v1256_v3 = vmul.f32 %v2530_v15, %v1236_v7  ;;  %v2622_v8 = vmul.f32 0.03125, %v1049_v18  ;;  %v1293_v39 = vmul.f32 %v2545_v62, %v1273_v31 }
 0x338   :  { %v1865_v4 = vpop.eup %1864  ;;  %v1208_v5 = vadd.f32 1e-05, %v1176_v51  ;;  %v1143_v47 = vmul.f32 0.03125, %v1121_v1 }
 0x339   :  { %v1276_v33 = vadd.f32 %v2535_v30, %v1256_v3  ;;  %v1235_v48 = vmul.f32 %v1865_v4, %v1187_v60  ;;  %v1321_v6 = vsel %vm1001_vm4, %v1293_v39, 0.0  ;;  %v1162_v24 = vmul.f32 %v2622_v8, %v2622_v8 }
 0x33a   :  { %1870 = vrsqrt.f32 %v1208_v5  ;;  %v1175_v11 = vsub.f32 %v1143_v47, %v1159_v61  ;;  %v1046_v44 = vpop.xlane.xlu0 %1045  ;;  %1322 = vadd.xlane.f32.xlu0 %v1321_v6  ;;  %v1194_v51 = vsub.f32 %v2500_v52, %v2622_v8 }
 0x33b   :  { %v1065_v63 = vmul.f32 0.03125, %v1046_v44  ;;  %v1130_v2 = vpop.xlane.xlu1 %1129  ;;  %v1296_v13 = vmul.f32 %v2545_v62, %v1276_v33  ;;  %v1255_v49 = vmul.f32 %v2530_v15, %v1235_v48  ;;  %v1618_v44 = vld [vmem:[%s2727_s6 + $0x4] ss:$0 sm:$0xff]  ;;  %s1903_s6 = smov [#allocation2]  }
 0x33c   :  { %v1867_v9 = vpop.eup %1866  ;;  %v1207_v50 = vadd.f32 1e-05, %v1175_v11  ;;  %v1146_v43 = vmul.f32 0.03125, %v1130_v2  ;;  %s1554_s20 = sshll.u32 %s1903_s6, 4  ;;  %s1555_s20 = int_to_ptr.vmem [resolvable:$true] %s1554_s20 }
 0x33d   :  { %v1330_v34 = vsel %vm1001_vm4, %v1296_v13, 0.0  ;;  %v1275_v12 = vadd.f32 %v2535_v30, %v1255_v49  ;;  %v1238_v10 = vmul.f32 %v1867_v9, %v1190_v21  ;;  %v1161_v53 = vmul.f32 %v1065_v63, %v1065_v63  ;;  %s1878_s21 = scalar_lea.vmem %s1555_s20, 16  ;;  %s1882_s22 = scalar_lea.vmem %s1555_s20, 32 }
 0x33e   :  { %1872 = vrsqrt.f32 %v1207_v50  ;;  %v1178_v25 = vsub.f32 %v1146_v43, %v1162_v24  ;;  %1331 = vadd.xlane.f32.xlu1 %v1330_v34  ;;  %v1127_v27 = vpop.xlane.xlu0 %1126  ;;  %v1193_v1 = vsub.f32 %v2502_v54, %v1065_v63  ;;  %p1879_p0 = scmp.ne.s32.totalorder %s1555_s20, %s1878_s21  ;;  %p1883_p1 = scmp.lt.s32.totalorder %s1555_s20, %s1555_s20 }
 0x33f   :  { %v1145_v19 = vmul.f32 0.03125, %v1127_v27  ;;  %v1295_v17 = vmul.f32 %v2545_v62, %v1275_v12  ;;  %v1258_v14 = vmul.f32 %v2530_v15, %v1238_v10  ;;  %p1884_p2 = scmp.lt.s32.totalorder %s1882_s22, %s1878_s21 }
 0x340   :  { %v1869_v58 = vpop.eup %1868  ;;  %v1210_v41 = vadd.f32 1e-05, %v1178_v25 }
 0x341   :  { %v1177_v37 = vsub.f32 %v1145_v19, %v1161_v53  ;;  %v1327_v59 = vsel %vm1001_vm4, %v1295_v17, 0.0  ;;  %v1237_v22 = vmul.f32 %v1869_v58, %v1189_v16  ;;  %v1278_v38 = vadd.f32 %v2535_v30, %v1258_v14  ;;  %p1885_p3 = por %p1884_p2, %p1883_p1 }
 0x342   :  { %1874 = vrsqrt.f32 %v1210_v41  ;;  %1328 = vadd.xlane.f32.xlu0 %v1327_v59 }
 0x343   :  { %v1209_v20 = vadd.f32 1e-05, %v1177_v37  ;;  %v1257_v29 = vmul.f32 %v2530_v15, %v1237_v22  ;;  %v1298_v55 = vmul.f32 %v2545_v62, %v1278_v38  ;;  %p1886_p4 = pnand %p1885_p3, %p1879_p0 }
 0x344   :  { %v1871_v23 = vpop.eup %1870 }
 0x345   :  { %1876 = vrsqrt.f32 %v1209_v20  ;;  %v1277_v0 = vadd.f32 %v2535_v30, %v1257_v29  ;;  %v1240_v40 = vmul.f32 %v1871_v23, %v1192_v42  ;;  %v1336_v56 = vsel %vm1001_vm4, %v1298_v55, 0.0 }
 0x346   :  { %1337 = vadd.xlane.f32.xlu1 %v1336_v56  ;;  %v1435_v56 = vlaneseq }
 0x347   :  { %v1297_v26 = vmul.f32 %v2545_v62, %v1277_v0  ;;  %v1260_v32 = vmul.f32 %v2530_v15, %v1240_v40 }
 0x348   :  { %v1873_v36 = vpop.eup %1872 }
 0x349   :  { %v1333_v57 = vsel %vm1001_vm4, %v1297_v26, 0.0  ;;  %v1280_v28 = vadd.f32 %v2535_v30, %v1260_v32  ;;  %v1239_v7 = vmul.f32 %v1873_v36, %v1191_v45  ;;  %v2673_v45 = vand.u32 127, %v1435_v56 }
 0x34a   :  { %1334 = vadd.xlane.f32.xlu0 %v1333_v57  ;;  %v2675_v32 = vshrl.u32 %v1435_v56, 7 }
 0x34b   :  { %v1300_v18 = vmul.f32 %v2545_v62, %v1280_v28  ;;  %v1259_v31 = vmul.f32 %v2530_v15, %v1239_v7  ;;  %v1441_v36 = vadd.s32 4294967288, %v2673_v45  ;;  %v1448_v57 = vadd.s32 4294967280, %v2673_v45 }
 0x34c   :  { %v1875_v35 = vpop.eup %1874 }
 0x34d   :  { %v1342_v46 = vsel %vm1001_vm4, %v1300_v18, 0.0  ;;  %v1279_v60 = vadd.f32 %v2535_v30, %v1259_v31  ;;  %v1242_v61 = vmul.f32 %v1875_v35, %v1194_v51  ;;  %v1444_v7 = vsub.s32 %v1441_v36, %v2675_v32 }
 0x34e   :  { %1343 = vadd.xlane.f32.xlu1 %v1342_v46  ;;  %v1439_v51 = vsub.s32 %v2673_v45, %v2675_v32  ;;  %v1451_v31 = vsub.s32 %v1448_v57, %v2675_v32  ;;  %v1462_v35 = vadd.s32 4294967264, %v2673_v45  ;;  %v1455_v46 = vadd.s32 4294967272, %v2673_v45 }
 0x34f   :  { %v1877_v3 = vpop.eup %1876  ;;  %v1299_v4 = vmul.f32 %v2545_v62, %v1279_v60  ;;  %v1262_v5 = vmul.f32 %v2530_v15, %v1242_v61 }
 0x350   :  { %v1241_v47 = vmul.f32 %v1877_v3, %v1193_v1 }
 0x351   :  { %v1339_v52 = vsel %vm1001_vm4, %v1299_v4, 0.0  ;;  %v1282_v8 = vadd.f32 %v2535_v30, %v1262_v5  ;;  %v1465_v4 = vsub.s32 %v1462_v35, %v2675_v32  ;;  %v1476_v5 = vadd.s32 4294967248, %v2673_v45 }
 0x352   :  { %1340 = vadd.xlane.f32.xlu0 %v1339_v52  ;;  %v1261_v39 = vmul.f32 %v2530_v15, %v1241_v47  ;;  %v1458_v47 = vsub.s32 %v1455_v46, %v2675_v32  ;;  %v1469_v52 = vadd.s32 4294967256, %v2673_v45 }
 0x353   :  { %v1302_v33 = vmul.f32 %v2545_v62, %v1282_v8 }
 0x354   :  { %v1281_v48 = vadd.f32 %v2535_v30, %v1261_v39 }
 0x355   :  { %v1348_v54 = vsel %vm1001_vm4, %v1302_v33, 0.0 }
 0x356   :  { %1349 = vadd.xlane.f32.xlu1 %v1348_v54  ;;  %v1301_v11 = vmul.f32 %v2545_v62, %v1281_v48  ;;  %v1479_v48 = vsub.s32 %v1476_v5, %v2675_v32  ;;  %v1490_v54 = vadd.s32 4294967232, %v2673_v45 }
 0x358   :  { %v1345_v6 = vsel %vm1001_vm4, %v1301_v11, 0.0 }
 0x359   :  { %1346 = vadd.xlane.f32.xlu0 %v1345_v6  ;;  %v1472_v6 = vsub.s32 %v1469_v52, %v2675_v32 }
 0x3ab   :  { %v1308_v63 = vpop.xlane.xlu1 %1307 }
 0x3ac   :  { %v1356_v2 = vadd.f32 %v1618_v44, %v1308_v63  ;;  %v1305_v13 = vpop.xlane.xlu0 %1304 }
 0x3ad   :  { %v1355_v15 = vadd.f32 %v1618_v44, %v1305_v13 }
 0x3ae   :  { %1391 = vperm.xlu1 %1812, %v1356_v2  }
 0x3af   :  { %1388 = vperm.xlu0 %1813, %v1355_v15  }
 0x3b3   :  { %v1314_v49 = vpop.xlane.xlu1 %1313 }
 0x3b4   :  { %v1358_v30 = vadd.f32 %v1618_v44, %v1314_v49  ;;  %v1493_v49 = vsub.s32 %v1490_v54, %v2675_v32 }
 0x3b6   :  { %1397 = vperm.xlu1 %1812, %v1358_v30   ;;  %v1504_v30 = vadd.s32 4294967216, %v2673_v45 }
 0x3b7   :  { %v1311_v9 = vpop.xlane.xlu0 %1310 }
 0x3b8   :  { %v1357_v21 = vadd.f32 %v1618_v44, %v1311_v9 }
 0x3ba   :  { %1394 = vperm.xlu1 %1812, %v1357_v21  }
 0x3bb   :  { %v1320_v62 = vpop.xlane.xlu1 %1319 }
 0x3bc   :  { %v1360_v24 = vadd.f32 %v1618_v44, %v1320_v62  ;;  %v1497_v62 = vadd.s32 4294967224, %v2673_v45 }
 0x3be   :  { %1403 = vperm.xlu1 %1812, %v1360_v24  }
 0x3bf   :  { %v1317_v50 = vpop.xlane.xlu0 %1316 }
 0x3c0   :  { %v1359_v43 = vadd.f32 %v1618_v44, %v1317_v50 }
 0x3c2   :  { %1400 = vperm.xlu1 %1812, %v1359_v43  }
 0x3c3   :  { %v1326_v34 = vpop.xlane.xlu1 %1325 }
 0x3c4   :  { %v1362_v12 = vadd.f32 %v1618_v44, %v1326_v34 }
 0x3c6   :  { %1409 = vperm.xlu1 %1812, %v1362_v12  }
 0x3c7   :  { %v1323_v25 = vpop.xlane.xlu0 %1322 }
 0x3c8   :  { %v1361_v27 = vadd.f32 %v1618_v44, %v1323_v25  ;;  %v1507_v25 = vsub.s32 %v1504_v30, %v2675_v32 }
 0x3ca   :  { %1406 = vperm.xlu1 %1812, %v1361_v27   ;;  %v1518_v27 = vadd.s32 4294967200, %v2673_v45 }
 0x3cb   :  { %v1332_v10 = vpop.xlane.xlu1 %1331 }
 0x3cc   :  { %v1364_v16 = vadd.f32 %v1618_v44, %v1332_v10 }
 0x3ce   :  { %1415 = vperm.xlu0 %1813, %v1364_v16   ;;  %v1500_v16 = vsub.s32 %v1497_v62, %v2675_v32 }
 0x3cf   :  { %v1329_v53 = vpop.xlane.xlu0 %1328 }
 0x3d0   :  { %v1363_v19 = vadd.f32 %v1618_v44, %v1329_v53  ;;  %v1511_v53 = vadd.s32 4294967208, %v2673_v45 }
 0x3d2   :  { %1412 = vperm.xlu1 %1812, %v1363_v19  }
 0x3d3   :  { %v1338_v17 = vpop.xlane.xlu1 %1337 }
 0x3d4   :  { %v1366_v58 = vadd.f32 %v1618_v44, %v1338_v17 }
 0x3d6   :  { %1421 = vperm.xlu0 %1813, %v1366_v58  }
 0x3d7   :  { %v1335_v41 = vpop.xlane.xlu0 %1334 }
 0x3d8   :  { %v1365_v14 = vadd.f32 %v1618_v44, %v1335_v41 }
 0x3da   :  { %1418 = vperm.xlu1 %1812, %v1365_v14  }
 0x3db   :  { %v1344_v37 = vpop.xlane.xlu1 %1343 }
 0x3dc   :  { %v1368_v59 = vadd.f32 %v1618_v44, %v1344_v37  ;;  %v1521_v37 = vsub.s32 %v1518_v27, %v2675_v32 }
 0x3de   :  { %1427 = vperm.xlu0 %1813, %v1368_v59  }
 0x3df   :  { %v1341_v22 = vpop.xlane.xlu0 %1340 }
 0x3e0   :  { %v1367_v38 = vadd.f32 %v1618_v44, %v1341_v22  ;;  %v1514_v22 = vsub.s32 %v1511_v53, %v2675_v32 }
 0x3e2   :  { %1424 = vperm.xlu1 %1812, %v1367_v38   ;;  %v1525_v38 = vadd.s32 4294967192, %v2673_v45 }
 0x3e3   :  { %v1350_v42 = vpop.xlane.xlu1 %1349 }
 0x3e4   :  { %v1370_v20 = vadd.f32 %v1618_v44, %v1350_v42 }
 0x3e6   :  { %1433 = vperm.xlu0 %1813, %v1370_v20   ;;  %v1347_v29 = vpop.xlane.xlu0 %1346  ;;  %v1532_v20 = vadd.s32 4294967184, %v2673_v45 }
 0x3e7   :  { %v1369_v23 = vadd.f32 %v1618_v44, %v1347_v29  ;;  %v1483_v44 = vadd.s32 4294967240, %v2673_v45 }
 0x3e8   :  { %v1535_v36 = vsub.s32 %v1532_v20, %v2675_v32 }
 0x3e9   :  { %1430 = vperm.xlu1 %1812, %v1369_v23   ;;  %v1486_v21 = vsub.s32 %v1483_v44, %v2675_v32  ;;  %v1539_v23 = vadd.s32 4294967176, %v2673_v45 }
 0x42d   :  { %v1392_v55 = vpop.permute.xlu1 %1391 }
 0x42e   :  { %v1389_v18 = vpop.permute.xlu0 %1388  ;;  %v1445_v60 = vrot.slane %v1392_v55, %v1444_v7 }
 0x42f   :  { %v1440_v61 = vrot.slane %v1389_v18, %v1439_v51 }
 0x431   :  { %v1447_v8 = vsel %vm1446_vm5, %v1445_v60, %v1440_v61 }
 0x435   :  { %v1398_v0 = vpop.permute.xlu1 %1397 }
 0x436   :  { %v1459_v11 = vrot.slane %v1398_v0, %v1458_v47 }
 0x439   :  { %v1395_v40 = vpop.permute.xlu1 %1394 }
 0x43a   :  { %v1452_v3 = vrot.slane %v1395_v40, %v1451_v31 }
 0x43c   :  { %v1454_v39 = vsel %vm1453_vm6, %v1452_v3, %v1447_v8 }
 0x43d   :  { %v1404_v26 = vpop.permute.xlu1 %1403  ;;  %v1461_v2 = vsel %vm1460_vm7, %v1459_v11, %v1454_v39 }
 0x43e   :  { %v1473_v9 = vrot.slane %v1404_v26, %v1472_v6  ;;  %v1528_v26 = vsub.s32 %v1525_v38, %v2675_v32 }
 0x441   :  { %v1401_v28 = vpop.permute.xlu1 %1400 }
 0x442   :  { %v1466_v33 = vrot.slane %v1401_v28, %v1465_v4  ;;  %v1542_v28 = vsub.s32 %v1539_v23, %v2675_v32 }
 0x444   :  { %v1468_v13 = vsel %vm1467_vm8, %v1466_v33, %v1461_v2 }
 0x445   :  { %v1410_v1 = vpop.permute.xlu1 %1409  ;;  %v1475_v50 = vsel %vm1474_vm9, %v1473_v9, %v1468_v13 }
 0x446   :  { %v1487_v10 = vrot.slane %v1410_v1, %v1486_v21 }
 0x449   :  { %v1407_v63 = vpop.permute.xlu1 %1406 }
 0x44a   :  { %v1480_v15 = vrot.slane %v1407_v63, %v1479_v48 }
 0x44c   :  { %v1482_v43 = vsel %vm1481_vm10, %v1480_v15, %v1475_v50 }
 0x44d   :  { %v1416_v34 = vpop.permute.xlu0 %1415  ;;  %v1489_v17 = vsel %vm1488_vm11, %v1487_v10, %v1482_v43 }
 0x44e   :  { %v1501_v59 = vrot.slane %v1416_v34, %v1500_v16 }
 0x451   :  { %v1413_v24 = vpop.permute.xlu1 %1412 }
 0x452   :  { %v1494_v12 = vrot.slane %v1413_v24, %v1493_v49 }
 0x454   :  { %v1496_v58 = vsel %vm1495_vm12, %v1494_v12, %v1489_v17 }
 0x455   :  { %v1422_v41 = vpop.permute.xlu0 %1421  ;;  %v1503_v29 = vsel %vm1502_vm13, %v1501_v59, %v1496_v58 }
 0x456   :  { %v1515_v56 = vrot.slane %v1422_v41, %v1514_v22 }
 0x459   :  { %v1419_v19 = vpop.permute.xlu1 %1418 }
 0x45a   :  { %v1508_v14 = vrot.slane %v1419_v19, %v1507_v25 }
 0x45c   :  { %v1510_v55 = vsel %vm1509_vm14, %v1508_v14, %v1503_v29 }
 0x45d   :  { %v1428_v0 = vpop.permute.xlu0 %1427  ;;  %v1517_v57 = vsel %vm1516_vm15, %v1515_v56, %v1510_v55 }
 0x45e   :  { %v1529_v18 = vrot.slane %v1428_v0, %v1528_v26 }
 0x461   :  { %v1425_v42 = vpop.permute.xlu1 %1424 }
 0x462   :  { %v1522_v40 = vrot.slane %v1425_v42, %v1521_v37 }
 0x464   :  { %v1524_v7 = vsel %vm1523_vm0, %v1522_v40, %v1517_v57 }
 0x465   :  { %v1434_v51 = vpop.permute.xlu0 %1433  ;;  %v1531_v46 = vsel %vm1530_vm1, %v1529_v18, %v1524_v7 }
 0x466   :  { %v1543_v35 = vrot.slane %v1434_v51, %v1542_v28 }
 0x468   :  { %v1431_v31 = vpop.permute.xlu1 %1430 }
 0x469   :  { %v1536_v45 = vrot.slane %v1431_v31, %v1535_v36 }
 0x46b   :  { %v1538_v60 = vsel %vm1537_vm2, %v1536_v45, %v1531_v46 }
 0x46c   :  { %v1545_v61 = vsel %vm1544_vm3, %v1543_v35, %v1538_v60 }
 0x46d   :  { %1547 = vst [vmem:[#allocation2] sm:$0x1] %v1545_v61 }
 0x46e   :  { %1889 = shalt.err (!%p1886_p4)
}
 0x46f   :  { %s1890_s24 = scalar_lea.hbm %s2728_s7, 16 }
 0x470   :  { %p1891_p5 = scmp.ne.s32.totalorder %s2728_s7, %s1890_s24  ;;  %p1894_p6 = scmp.lt.u32.totalorder %s1890_s24, %s2728_s7 }
 0x472   :  { %p1896_p7 = pnand %p1894_p6, %p1891_p5 }
 0x474   :  { %1899 = shalt.err (!%p1896_p7)
}
 0x475   :  { %1557 = dma.vmem_to_hbm [thread:$0]  %s1555_s20, 16, %s2728_s7, [#allocation3]  }
 0x476   :  { %1900 = dma.done.wait [#allocation3], 16  }
 0x477   :  { %1901 = vsyncadd [#allocation3], 4294967280 }
 0x478   :  { %1561 = vsyncpa [#allocation3], 1 }

</bundles_post_ra>
